<compile_context>
chip_gen: v5e
topology: v5e:2x2
jax: 0.10.0
libtpu: 0.0.40
codegen_flags: <defaults>
</compile_context>

<pallas_src>
import numpy as np

import jax
import jax.numpy as jnp
from jax.experimental import pallas as pl
from jax.experimental.pallas import tpu as pltpu


# ----------------------------------------------------------------------------
# Host-side, one-time weight re-layout (pure constant work, outside jit)
# ----------------------------------------------------------------------------
def prepare_params(p):
    f32 = np.float32
    w1 = np.asarray(p["w1"], f32); b1 = np.asarray(p["b1"], f32)
    w3 = np.asarray(p["w3"], f32); b3 = np.asarray(p["b3"], f32)
    w5 = np.asarray(p["w5"], f32); b5 = np.asarray(p["b5"], f32)
    w6 = np.asarray(p["w6"], f32); b6 = np.asarray(p["b6"], f32)
    wo = np.asarray(p["wout"], f32); bout = np.asarray(p["bout"], f32)

    j28 = np.arange(28)
    j10 = np.arange(10)

    # c1 (1->4, k=5, pad=2): banded matrices per kernel row over the UNPADDED
    # 28-wide input columns (column padding folded in by truncating bands):
    #   B1[di, j+dj-2, co*28+j] = w1[co, 0, di, dj]   for 0 <= j+dj-2 < 28
    B1 = np.zeros((5, 28, 4 * 28), f32)
    for di in range(5):
        for dj in range(5):
            jin = j28 + dj - 2
            m = (jin >= 0) & (jin < 28)
            for co in range(4):
                B1[di, jin[m], co * 28 + j28[m]] = w1[co, 0, di, dj]
    bb1 = np.repeat(b1, 28)[None, :]                      # (1, 112)

    # s2 AvgPool(2,2): row half (carries the full 1/4) + 0/1 column selection.
    S2L = np.zeros((14, 28), f32)
    S2L[np.arange(14), 2 * np.arange(14)] = 0.25
    S2L[np.arange(14), 2 * np.arange(14) + 1] = 0.25
    S2R = np.zeros((4 * 28, 4 * 14), f32)                 # column pool (0/1)
    for c in range(4):
        S2R[c * 28 + j28, c * 14 + j28 // 2] = 1.0

    # c3 (4->16, k=5, valid): banded (4*14, 16*10), then fold S2R.
    #   B3[di, ci*14 + j+dj, co*10+j] = w3[co, ci, di, dj]
    B3 = np.zeros((5, 4 * 14, 16 * 10), f32)
    for di in range(5):
        for ci in range(4):
            for dj in range(5):
                for co in range(16):
                    B3[di, ci * 14 + j10 + dj, co * 10 + j10] = w3[co, ci, di, dj]
    B3f = np.einsum("kr,drn->dkn", S2R, B3)               # (5, 112, 160)
    bb3 = np.repeat(b3, 10)[None, :]                      # (1, 160)

    # s4 AvgPool(2,2): row half + column selection folded into c5 weights.
    S4L = np.zeros((5, 10), f32)
    S4L[np.arange(5), 2 * np.arange(5)] = 0.25
    S4L[np.arange(5), 2 * np.arange(5) + 1] = 0.25
    S4R = np.zeros((16 * 10, 16 * 5), f32)
    for c in range(16):
        S4R[c * 10 + j10, c * 5 + j10 // 2] = 1.0

    # c5 (16->96, k=5 on 5x5 -> 1x1): per kernel-row weight (16*5, 96),
    #   W5[di, ci*5+dj, co] = w5[co, ci, di, dj], then fold S4R -> (160, 96).
    W5 = np.transpose(w5, (2, 1, 3, 0)).reshape(5, 80, 96).astype(f32)
    W5f = np.einsum("kr,drn->dkn", S4R, W5)               # (5, 160, 96)

    # Fold the whole affine tail (c5 bias, f6, output) into the banded c5
    # weights.  Exact: no nonlinearity after c5 or f6 in this module.
    W6 = np.ascontiguousarray(w6.T)                       # (96, 84)
    WOp = np.zeros((84, 128), f32); WOp[:, :10] = wo.T    # lane-padded output
    T = W6 @ WOp                                          # (96, 128)
    W5o = np.einsum("dkc,cn->dkn", W5f, T).astype(f32)    # (5, 160, 128)
    bo = (b5 @ T + b6 @ WOp)[None, :].astype(f32)         # (1, 128)
    bo[0, :10] += bout

    host = dict(B1=B1, bb1=bb1, S2L=S2L, B3f=B3f, bb3=bb3, S4L=S4L,
                W5o=W5o, bo=bo)
    return {k: jnp.asarray(v) for k, v in host.items()}


# ----------------------------------------------------------------------------
# The single fused kernel: TB images (28x28) per grid step.
# ----------------------------------------------------------------------------
def _lenet_kernel(x_ref, b1_ref, bb1_ref, s2_ref, b3_ref, bb3_ref, s4_ref,
                  w5o_ref, bo_ref, out_ref, xp_s, h2_s, g4_s):
    f32 = jnp.float32
    tb = x_ref.shape[0]

    # Zero the row-padded image scratch once: the 2-row top/bottom borders
    # stay zero, rows 2..29 are fully overwritten for every image.
    xp_s[...] = jnp.zeros_like(xp_s)

    def per_image(t, carry):
        # ---- "padding=2" on rows (columns already folded into B1) ---------
        xp_s[2:30, :] = x_ref[t]                           # (28, 28) tile

        # ---- c1: Conv2d(1->4, k=5, pad=2) + ReLU as 5 banded matmuls ------
        a1 = jnp.dot(xp_s[0:28, :], b1_ref[0], preferred_element_type=f32)
        for di in range(1, 5):
            a1 = a1 + jnp.dot(xp_s[di:di + 28, :], b1_ref[di],
                              preferred_element_type=f32)
        a1 = jnp.maximum(a1 + bb1_ref[...], 0.0)           # (28, 112)

        # ---- s2: AvgPool(2,2) row half (column half folded into B3f) ------
        h2_s[...] = jnp.dot(s2_ref[...], a1, preferred_element_type=f32)

        # ---- c3: Conv2d(4->16, k=5) + ReLU ---------------------------------
        a3 = jnp.dot(h2_s[0:10, :], b3_ref[0], preferred_element_type=f32)
        for di in range(1, 5):
            a3 = a3 + jnp.dot(h2_s[di:di + 10, :], b3_ref[di],
                              preferred_element_type=f32)
        a3 = jnp.maximum(a3 + bb3_ref[...], 0.0)           # (10, 160)

        # ---- s4: AvgPool(2,2) row half (column half folded into W5o) ------
        g4 = jnp.dot(s4_ref[...], a3, preferred_element_type=f32)  # (5, 160)

        # Stash image t's pooled features, split by c5 kernel row.
        for di in range(5):
            g4_s[di, pl.ds(t, 1), :] = g4[di:di + 1, :]
        return carry

    jax.lax.fori_loop(0, tb, per_image, 0)

    # ---- fused affine tail: c5 -> flatten -> f6 -> output, batched over ----
    # ---- TB images: 5 banded (TB,160)@(160,128) matmuls, lane-dense store. -
    y = jnp.dot(g4_s[0], w5o_ref[0], preferred_element_type=f32)
    for di in range(1, 5):
        y = y + jnp.dot(g4_s[di], w5o_ref[di], preferred_element_type=f32)
    out_ref[...] = y + bo_ref[...]


# ----------------------------------------------------------------------------
# Forward wrapper (jittable): one pallas_call over batch tiles of TB images.
# ----------------------------------------------------------------------------
def _round_up(x, m):
    return (x + m - 1) // m * m


def lenet_forward(x_nchw, w, tb=64):
    N = x_nchw.shape[0]
    TB = int(min(tb, _round_up(max(N, 1), 8)))             # 8-aligned batch tile
    Npad = _round_up(N, TB)
    x = x_nchw
    if Npad != N:
        x = jnp.pad(x, ((0, Npad - N), (0, 0), (0, 0), (0, 0)))

    out = pl.pallas_call(
        _lenet_kernel,
        out_shape=jax.ShapeDtypeStruct((Npad, 128), jnp.float32),
        grid=(Npad // TB,),
        in_specs=[
            pl.BlockSpec((TB, None, 28, 28), lambda n: (n, 0, 0, 0)),  # images
            pl.BlockSpec((5, 28, 112), lambda n: (0, 0, 0)),           # B1
            pl.BlockSpec((1, 112), lambda n: (0, 0)),                  # bb1
            pl.BlockSpec((14, 28), lambda n: (0, 0)),                  # S2L
            pl.BlockSpec((5, 112, 160), lambda n: (0, 0, 0)),          # B3f
            pl.BlockSpec((1, 160), lambda n: (0, 0)),                  # bb3
            pl.BlockSpec((5, 10), lambda n: (0, 0)),                   # S4L
            pl.BlockSpec((5, 160, 128), lambda n: (0, 0, 0)),          # W5o
            pl.BlockSpec((1, 128), lambda n: (0, 0)),                  # bo
        ],
        out_specs=pl.BlockSpec((TB, 128), lambda n: (n, 0)),
        scratch_shapes=[
            pltpu.VMEM((32, 28), jnp.float32),       # row-padded image
            pltpu.VMEM((14, 112), jnp.float32),      # s2 half-pool
            pltpu.VMEM((5, TB, 160), jnp.float32),   # pooled features / c5 row
        ],
        compiler_params=pltpu.CompilerParams(
            dimension_semantics=("parallel",)),
    )(x, w["B1"], w["bb1"], w["S2L"], w["B3f"], w["bb3"], w["S4L"],
      w["W5o"], w["bo"])

    return out[:N, :10]


# ----------------------------------------------------------------------------
# Pure-JAX reference (correctness check only)
# ----------------------------------------------------------------------------
def _avgpool_ref(x):
    N, C, H, W = x.shape
    return x.reshape(N, C, H // 2, 2, W // 2, 2).mean(axis=(3, 5))


def lenet_reference(x, p):
    dn = ("NCHW", "OIHW", "NCHW")
    y = jax.lax.conv_general_dilated(x, p["w1"], (1, 1), ((2, 2), (2, 2)),
                                     dimension_numbers=dn)
    y = jax.nn.relu(y + p["b1"][None, :, None, None])
    y = _avgpool_ref(y)
    y = jax.lax.conv_general_dilated(y, p["w3"], (1, 1), "VALID",
                                     dimension_numbers=dn)
    y = jax.nn.relu(y + p["b3"][None, :, None, None])
    y = _avgpool_ref(y)
    y = jax.lax.conv_general_dilated(y, p["w5"], (1, 1), "VALID",
                                     dimension_numbers=dn)
    y = y + p["b5"][None, :, None, None]
    y = y.reshape(y.shape[0], -1)
    y = y @ p["w6"].T + p["b6"]
    y = y @ p["wout"].T + p["bout"]
    return y


if __name__ == "__main__":
    key = jax.random.PRNGKey(0)
    ks = jax.random.split(key, 11)
    # Deterministic synthetic parameters, shapes mirror the PyTorch module.
    params = {
        "w1": jax.random.normal(ks[0], (4, 1, 5, 5), jnp.float32) * 0.2,
        "b1": jax.random.normal(ks[1], (4,), jnp.float32) * 0.1,
        "w3": jax.random.normal(ks[2], (16, 4, 5, 5), jnp.float32) * 0.1,
        "b3": jax.random.normal(ks[3], (16,), jnp.float32) * 0.1,
        "w5": jax.random.normal(ks[4], (96, 16, 5, 5), jnp.float32) * 0.05,
        "b5": jax.random.normal(ks[5], (96,), jnp.float32) * 0.1,
        "w6": jax.random.normal(ks[6], (84, 96), jnp.float32) * 0.1,
        "b6": jax.random.normal(ks[7], (84,), jnp.float32) * 0.1,
        "wout": jax.random.normal(ks[8], (10, 84), jnp.float32) * 0.1,
        "bout": jax.random.normal(ks[9], (10,), jnp.float32) * 0.1,
    }
    # LeNet5's flatten-to-96 requires a 28x28 input (1x1 spatial after c5).
    x = jax.random.normal(ks[10], (2, 1, 28, 28), jnp.float32)

    prepped = prepare_params(params)          # one-time host-side re-layout
    fwd = jax.jit(lenet_forward)

    out = jax.block_until_ready(fwd(x, prepped))
    assert out.shape == (2, 10), out.shape

    ref = lenet_reference(x, params)
    err = float(jnp.max(jnp.abs(out - ref)))
    if err > 1e-3:
        raise AssertionError(f"Pallas output mismatch vs reference, max err={err}")
    print("KERNEL_OK")
</pallas_src>

<mosaic_0001>
module attributes {stable_mosaic.version = 11 : i64} {
  func.func @_lenet_kernel(%arg0: i32, %arg1: memref<8x1x28x28xf32, #tpu.memory_space<vmem>>, %arg2: memref<5x28x112xf32, #tpu.memory_space<vmem>>, %arg3: memref<1x112xf32, #tpu.memory_space<vmem>>, %arg4: memref<14x28xf32, #tpu.memory_space<vmem>>, %arg5: memref<5x112x160xf32, #tpu.memory_space<vmem>>, %arg6: memref<1x160xf32, #tpu.memory_space<vmem>>, %arg7: memref<5x10xf32, #tpu.memory_space<vmem>>, %arg8: memref<5x160x128xf32, #tpu.memory_space<vmem>>, %arg9: memref<1x128xf32, #tpu.memory_space<vmem>>, %arg10: memref<8x128xf32, #tpu.memory_space<vmem>>, %arg11: memref<32x28xf32, #tpu.memory_space<vmem>>, %arg12: memref<14x112xf32, #tpu.memory_space<vmem>>, %arg13: memref<5x8x160xf32, #tpu.memory_space<vmem>>) attributes {dimension_semantics = [#tpu.dimension_semantics<parallel>], iteration_bounds = array<i64: 1>, scalar_prefetch = 0 : i64, scratch_operands = 3 : i64, tpu.core_type = #tpu.core_type<tc>, window_params = [{transform_indices = @transform_0, window_bounds = array<i64: 8, 1, 28, 28>}, {pipeline_mode = #tpu.pipeline_mode<synchronous>, transform_indices = @transform_1, window_bounds = array<i64: 5, 28, 112>}, {pipeline_mode = #tpu.pipeline_mode<synchronous>, transform_indices = @transform_2, window_bounds = array<i64: 1, 112>}, {pipeline_mode = #tpu.pipeline_mode<synchronous>, transform_indices = @transform_3, window_bounds = array<i64: 14, 28>}, {pipeline_mode = #tpu.pipeline_mode<synchronous>, transform_indices = @transform_4, window_bounds = array<i64: 5, 112, 160>}, {pipeline_mode = #tpu.pipeline_mode<synchronous>, transform_indices = @transform_5, window_bounds = array<i64: 1, 160>}, {pipeline_mode = #tpu.pipeline_mode<synchronous>, transform_indices = @transform_6, window_bounds = array<i64: 5, 10>}, {pipeline_mode = #tpu.pipeline_mode<synchronous>, transform_indices = @transform_7, window_bounds = array<i64: 5, 160, 128>}, {pipeline_mode = #tpu.pipeline_mode<synchronous>, transform_indices = @transform_8, window_bounds = array<i64: 1, 128>}, {transform_indices = @transform_9, window_bounds = array<i64: 8, 128>}]} {
    %cst = arith.constant 0.000000e+00 : f32
    %0 = vector.broadcast %cst : f32 to vector<32x28xf32>
    %c0 = arith.constant 0 : index
    %c0_0 = arith.constant 0 : index
    %1 = vector.load %arg11[%c0, %c0_0] : memref<32x28xf32, #tpu.memory_space<vmem>>, vector<32x28xf32>
    tpu.vector_store %arg11[%c0, %c0_0], %0 {strides = array<i32>} : memref<32x28xf32, #tpu.memory_space<vmem>>, vector<32x28xf32>,
    %c0_i32 = arith.constant 0 : i32
    %c8_i32 = arith.constant 8 : i32
    %2 = arith.addi %c0_i32, %c8_i32 : i32
    %c1_i32 = arith.constant 1 : i32
    scf.for %arg14 = %c0_i32 to %2 step %c1_i32  : i32 {
      %36 = arith.index_cast %arg14 : i32 to index
      %c0_37 = arith.constant 0 : index
      %c0_38 = arith.constant 0 : index
      %c0_39 = arith.constant 0 : index
      %37 = vector.load %arg1[%36, %c0_37, %c0_38, %c0_39] : memref<8x1x28x28xf32, #tpu.memory_space<vmem>>, vector<1x1x28x28xf32>
      %38 = vector.shape_cast %37 : vector<1x1x28x28xf32> to vector<28x28xf32>
      %c2_40 = arith.constant 2 : index
      %c0_41 = arith.constant 0 : index
      %39 = vector.load %arg11[%c2_40, %c0_41] : memref<32x28xf32, #tpu.memory_space<vmem>>, vector<28x28xf32>
      tpu.vector_store %arg11[%c2_40, %c0_41], %38 {strides = array<i32>} : memref<32x28xf32, #tpu.memory_space<vmem>>, vector<28x28xf32>,
      %c0_42 = arith.constant 0 : index
      %c0_43 = arith.constant 0 : index
      %40 = vector.load %arg11[%c0_42, %c0_43] : memref<32x28xf32, #tpu.memory_space<vmem>>, vector<28x28xf32>
      %c0_44 = arith.constant 0 : index
      %c0_45 = arith.constant 0 : index
      %c0_46 = arith.constant 0 : index
      %41 = vector.load %arg2[%c0_44, %c0_45, %c0_46] : memref<5x28x112xf32, #tpu.memory_space<vmem>>, vector<1x28x112xf32>
      %42 = vector.shape_cast %41 : vector<1x28x112xf32> to vector<28x112xf32>
      %cst_47 = arith.constant dense<0.000000e+00> : vector<28x112xf32>
      %43 = tpu.matmul %40, %42, %cst_47 {dimension_numbers = #tpu.dot_dimension_numbers<[1], [0], [0], [1], [0, 0, 1, 1], [], []>} : vector<28x28xf32>, vector<28x112xf32>, vector<28x112xf32> -> vector<28x112xf32>
      %c1_48 = arith.constant 1 : index
      %c0_49 = arith.constant 0 : index
      %44 = vector.load %arg11[%c1_48, %c0_49] : memref<32x28xf32, #tpu.memory_space<vmem>>, vector<28x28xf32>
      %c1_50 = arith.constant 1 : index
      %c0_51 = arith.constant 0 : index
      %c0_52 = arith.constant 0 : index
      %45 = vector.load %arg2[%c1_50, %c0_51, %c0_52] : memref<5x28x112xf32, #tpu.memory_space<vmem>>, vector<1x28x112xf32>
      %46 = vector.shape_cast %45 : vector<1x28x112xf32> to vector<28x112xf32>
      %cst_53 = arith.constant dense<0.000000e+00> : vector<28x112xf32>
      %47 = tpu.matmul %44, %46, %cst_53 {dimension_numbers = #tpu.dot_dimension_numbers<[1], [0], [0], [1], [0, 0, 1, 1], [], []>} : vector<28x28xf32>, vector<28x112xf32>, vector<28x112xf32> -> vector<28x112xf32>
      %48 = arith.addf %43, %47 : vector<28x112xf32>
      %c2_54 = arith.constant 2 : index
      %c0_55 = arith.constant 0 : index
      %49 = vector.load %arg11[%c2_54, %c0_55] : memref<32x28xf32, #tpu.memory_space<vmem>>, vector<28x28xf32>
      %c2_56 = arith.constant 2 : index
      %c0_57 = arith.constant 0 : index
      %c0_58 = arith.constant 0 : index
      %50 = vector.load %arg2[%c2_56, %c0_57, %c0_58] : memref<5x28x112xf32, #tpu.memory_space<vmem>>, vector<1x28x112xf32>
      %51 = vector.shape_cast %50 : vector<1x28x112xf32> to vector<28x112xf32>
      %cst_59 = arith.constant dense<0.000000e+00> : vector<28x112xf32>
      %52 = tpu.matmul %49, %51, %cst_59 {dimension_numbers = #tpu.dot_dimension_numbers<[1], [0], [0], [1], [0, 0, 1, 1], [], []>} : vector<28x28xf32>, vector<28x112xf32>, vector<28x112xf32> -> vector<28x112xf32>
      %53 = arith.addf %48, %52 : vector<28x112xf32>
      %c3_60 = arith.constant 3 : index
      %c0_61 = arith.constant 0 : index
      %54 = vector.load %arg11[%c3_60, %c0_61] : memref<32x28xf32, #tpu.memory_space<vmem>>, vector<28x28xf32>
      %c3_62 = arith.constant 3 : index
      %c0_63 = arith.constant 0 : index
      %c0_64 = arith.constant 0 : index
      %55 = vector.load %arg2[%c3_62, %c0_63, %c0_64] : memref<5x28x112xf32, #tpu.memory_space<vmem>>, vector<1x28x112xf32>
      %56 = vector.shape_cast %55 : vector<1x28x112xf32> to vector<28x112xf32>
      %cst_65 = arith.constant dense<0.000000e+00> : vector<28x112xf32>
      %57 = tpu.matmul %54, %56, %cst_65 {dimension_numbers = #tpu.dot_dimension_numbers<[1], [0], [0], [1], [0, 0, 1, 1], [], []>} : vector<28x28xf32>, vector<28x112xf32>, vector<28x112xf32> -> vector<28x112xf32>
      %58 = arith.addf %53, %57 : vector<28x112xf32>
      %c4_66 = arith.constant 4 : index
      %c0_67 = arith.constant 0 : index
      %59 = vector.load %arg11[%c4_66, %c0_67] : memref<32x28xf32, #tpu.memory_space<vmem>>, vector<28x28xf32>
      %c4_68 = arith.constant 4 : index
      %c0_69 = arith.constant 0 : index
      %c0_70 = arith.constant 0 : index
      %60 = vector.load %arg2[%c4_68, %c0_69, %c0_70] : memref<5x28x112xf32, #tpu.memory_space<vmem>>, vector<1x28x112xf32>
      %61 = vector.shape_cast %60 : vector<1x28x112xf32> to vector<28x112xf32>
      %cst_71 = arith.constant dense<0.000000e+00> : vector<28x112xf32>
      %62 = tpu.matmul %59, %61, %cst_71 {dimension_numbers = #tpu.dot_dimension_numbers<[1], [0], [0], [1], [0, 0, 1, 1], [], []>} : vector<28x28xf32>, vector<28x112xf32>, vector<28x112xf32> -> vector<28x112xf32>
      %63 = arith.addf %58, %62 : vector<28x112xf32>
      %c0_72 = arith.constant 0 : index
      %c0_73 = arith.constant 0 : index
      %64 = vector.load %arg3[%c0_72, %c0_73] : memref<1x112xf32, #tpu.memory_space<vmem>>, vector<1x112xf32>
      %65 = vector.broadcast %64 : vector<1x112xf32> to vector<28x112xf32>
      %66 = arith.addf %63, %65 : vector<28x112xf32>
      %cst_74 = arith.constant 0.000000e+00 : f32
      %67 = vector.broadcast %cst_74 : f32 to vector<28x112xf32>
      %68 = arith.maximumf %66, %67 : vector<28x112xf32>
      %c0_75 = arith.constant 0 : index
      %c0_76 = arith.constant 0 : index
      %69 = vector.load %arg4[%c0_75, %c0_76] : memref<14x28xf32, #tpu.memory_space<vmem>>, vector<14x28xf32>
      %cst_77 = arith.constant dense<0.000000e+00> : vector<14x112xf32>
      %70 = tpu.matmul %69, %68, %cst_77 {dimension_numbers = #tpu.dot_dimension_numbers<[1], [0], [0], [1], [0, 0, 1, 1], [], []>} : vector<14x28xf32>, vector<28x112xf32>, vector<14x112xf32> -> vector<14x112xf32>
      %c0_78 = arith.constant 0 : index
      %c0_79 = arith.constant 0 : index
      %71 = vector.load %arg12[%c0_78, %c0_79] : memref<14x112xf32, #tpu.memory_space<vmem>>, vector<14x112xf32>
      tpu.vector_store %arg12[%c0_78, %c0_79], %70 {strides = array<i32>} : memref<14x112xf32, #tpu.memory_space<vmem>>, vector<14x112xf32>,
      %c0_80 = arith.constant 0 : index
      %c0_81 = arith.constant 0 : index
      %72 = vector.load %arg12[%c0_80, %c0_81] : memref<14x112xf32, #tpu.memory_space<vmem>>, vector<10x112xf32>
      %c0_82 = arith.constant 0 : index
      %c0_83 = arith.constant 0 : index
      %c0_84 = arith.constant 0 : index
      %73 = vector.load %arg5[%c0_82, %c0_83, %c0_84] : memref<5x112x160xf32, #tpu.memory_space<vmem>>, vector<1x112x160xf32>
      %74 = vector.shape_cast %73 : vector<1x112x160xf32> to vector<112x160xf32>
      %cst_85 = arith.constant dense<0.000000e+00> : vector<10x160xf32>
      %75 = tpu.matmul %72, %74, %cst_85 {dimension_numbers = #tpu.dot_dimension_numbers<[1], [0], [0], [1], [0, 0, 1, 1], [], []>} : vector<10x112xf32>, vector<112x160xf32>, vector<10x160xf32> -> vector<10x160xf32>
      %c1_86 = arith.constant 1 : index
      %c0_87 = arith.constant 0 : index
      %76 = vector.load %arg12[%c1_86, %c0_87] : memref<14x112xf32, #tpu.memory_space<vmem>>, vector<10x112xf32>
      %c1_88 = arith.constant 1 : index
      %c0_89 = arith.constant 0 : index
      %c0_90 = arith.constant 0 : index
      %77 = vector.load %arg5[%c1_88, %c0_89, %c0_90] : memref<5x112x160xf32, #tpu.memory_space<vmem>>, vector<1x112x160xf32>
      %78 = vector.shape_cast %77 : vector<1x112x160xf32> to vector<112x160xf32>
      %cst_91 = arith.constant dense<0.000000e+00> : vector<10x160xf32>
      %79 = tpu.matmul %76, %78, %cst_91 {dimension_numbers = #tpu.dot_dimension_numbers<[1], [0], [0], [1], [0, 0, 1, 1], [], []>} : vector<10x112xf32>, vector<112x160xf32>, vector<10x160xf32> -> vector<10x160xf32>
      %80 = arith.addf %75, %79 : vector<10x160xf32>
      %c2_92 = arith.constant 2 : index
      %c0_93 = arith.constant 0 : index
      %81 = vector.load %arg12[%c2_92, %c0_93] : memref<14x112xf32, #tpu.memory_space<vmem>>, vector<10x112xf32>
      %c2_94 = arith.constant 2 : index
      %c0_95 = arith.constant 0 : index
      %c0_96 = arith.constant 0 : index
      %82 = vector.load %arg5[%c2_94, %c0_95, %c0_96] : memref<5x112x160xf32, #tpu.memory_space<vmem>>, vector<1x112x160xf32>
      %83 = vector.shape_cast %82 : vector<1x112x160xf32> to vector<112x160xf32>
      %cst_97 = arith.constant dense<0.000000e+00> : vector<10x160xf32>
      %84 = tpu.matmul %81, %83, %cst_97 {dimension_numbers = #tpu.dot_dimension_numbers<[1], [0], [0], [1], [0, 0, 1, 1], [], []>} : vector<10x112xf32>, vector<112x160xf32>, vector<10x160xf32> -> vector<10x160xf32>
      %85 = arith.addf %80, %84 : vector<10x160xf32>
      %c3_98 = arith.constant 3 : index
      %c0_99 = arith.constant 0 : index
      %86 = vector.load %arg12[%c3_98, %c0_99] : memref<14x112xf32, #tpu.memory_space<vmem>>, vector<10x112xf32>
      %c3_100 = arith.constant 3 : index
      %c0_101 = arith.constant 0 : index
      %c0_102 = arith.constant 0 : index
      %87 = vector.load %arg5[%c3_100, %c0_101, %c0_102] : memref<5x112x160xf32, #tpu.memory_space<vmem>>, vector<1x112x160xf32>
      %88 = vector.shape_cast %87 : vector<1x112x160xf32> to vector<112x160xf32>
      %cst_103 = arith.constant dense<0.000000e+00> : vector<10x160xf32>
      %89 = tpu.matmul %86, %88, %cst_103 {dimension_numbers = #tpu.dot_dimension_numbers<[1], [0], [0], [1], [0, 0, 1, 1], [], []>} : vector<10x112xf32>, vector<112x160xf32>, vector<10x160xf32> -> vector<10x160xf32>
      %90 = arith.addf %85, %89 : vector<10x160xf32>
      %c4_104 = arith.constant 4 : index
      %c0_105 = arith.constant 0 : index
      %91 = vector.load %arg12[%c4_104, %c0_105] : memref<14x112xf32, #tpu.memory_space<vmem>>, vector<10x112xf32>
      %c4_106 = arith.constant 4 : index
      %c0_107 = arith.constant 0 : index
      %c0_108 = arith.constant 0 : index
      %92 = vector.load %arg5[%c4_106, %c0_107, %c0_108] : memref<5x112x160xf32, #tpu.memory_space<vmem>>, vector<1x112x160xf32>
      %93 = vector.shape_cast %92 : vector<1x112x160xf32> to vector<112x160xf32>
      %cst_109 = arith.constant dense<0.000000e+00> : vector<10x160xf32>
      %94 = tpu.matmul %91, %93, %cst_109 {dimension_numbers = #tpu.dot_dimension_numbers<[1], [0], [0], [1], [0, 0, 1, 1], [], []>} : vector<10x112xf32>, vector<112x160xf32>, vector<10x160xf32> -> vector<10x160xf32>
      %95 = arith.addf %90, %94 : vector<10x160xf32>
      %c0_110 = arith.constant 0 : index
      %c0_111 = arith.constant 0 : index
      %96 = vector.load %arg6[%c0_110, %c0_111] : memref<1x160xf32, #tpu.memory_space<vmem>>, vector<1x160xf32>
      %97 = vector.broadcast %96 : vector<1x160xf32> to vector<10x160xf32>
      %98 = arith.addf %95, %97 : vector<10x160xf32>
      %cst_112 = arith.constant 0.000000e+00 : f32
      %99 = vector.broadcast %cst_112 : f32 to vector<10x160xf32>
      %100 = arith.maximumf %98, %99 : vector<10x160xf32>
      %c0_113 = arith.constant 0 : index
      %c0_114 = arith.constant 0 : index
      %101 = vector.load %arg7[%c0_113, %c0_114] : memref<5x10xf32, #tpu.memory_space<vmem>>, vector<5x10xf32>
      %cst_115 = arith.constant dense<0.000000e+00> : vector<5x160xf32>
      %102 = tpu.matmul %101, %100, %cst_115 {dimension_numbers = #tpu.dot_dimension_numbers<[1], [0], [0], [1], [0, 0, 1, 1], [], []>} : vector<5x10xf32>, vector<10x160xf32>, vector<5x160xf32> -> vector<5x160xf32>
      %103 = vector.extract_strided_slice %102 {offsets = [0, 0], sizes = [1, 160], strides = [1, 1]} : vector<5x160xf32> to vector<1x160xf32>
      %c0_116 = arith.constant 0 : index
      %104 = arith.index_cast %arg14 : i32 to index
      %c0_117 = arith.constant 0 : index
      %105 = vector.load %arg13[%c0_116, %104, %c0_117] : memref<5x8x160xf32, #tpu.memory_space<vmem>>, vector<1x1x160xf32>
      %106 = vector.shape_cast %105 : vector<1x1x160xf32> to vector<1x160xf32>
      %107 = vector.shape_cast %103 : vector<1x160xf32> to vector<1x1x160xf32>
      tpu.vector_store %arg13[%c0_116, %104, %c0_117], %107 {strides = array<i32>} : memref<5x8x160xf32, #tpu.memory_space<vmem>>, vector<1x1x160xf32>,
      %108 = vector.extract_strided_slice %102 {offsets = [1, 0], sizes = [1, 160], strides = [1, 1]} : vector<5x160xf32> to vector<1x160xf32>
      %c1_118 = arith.constant 1 : index
      %109 = arith.index_cast %arg14 : i32 to index
      %c0_119 = arith.constant 0 : index
      %110 = vector.load %arg13[%c1_118, %109, %c0_119] : memref<5x8x160xf32, #tpu.memory_space<vmem>>, vector<1x1x160xf32>
      %111 = vector.shape_cast %110 : vector<1x1x160xf32> to vector<1x160xf32>
      %112 = vector.shape_cast %108 : vector<1x160xf32> to vector<1x1x160xf32>
      tpu.vector_store %arg13[%c1_118, %109, %c0_119], %112 {strides = array<i32>} : memref<5x8x160xf32, #tpu.memory_space<vmem>>, vector<1x1x160xf32>,
      %113 = vector.extract_strided_slice %102 {offsets = [2, 0], sizes = [1, 160], strides = [1, 1]} : vector<5x160xf32> to vector<1x160xf32>
      %c2_120 = arith.constant 2 : index
      %114 = arith.index_cast %arg14 : i32 to index
      %c0_121 = arith.constant 0 : index
      %115 = vector.load %arg13[%c2_120, %114, %c0_121] : memref<5x8x160xf32, #tpu.memory_space<vmem>>, vector<1x1x160xf32>
      %116 = vector.shape_cast %115 : vector<1x1x160xf32> to vector<1x160xf32>
      %117 = vector.shape_cast %113 : vector<1x160xf32> to vector<1x1x160xf32>
      tpu.vector_store %arg13[%c2_120, %114, %c0_121], %117 {strides = array<i32>} : memref<5x8x160xf32, #tpu.memory_space<vmem>>, vector<1x1x160xf32>,
      %118 = vector.extract_strided_slice %102 {offsets = [3, 0], sizes = [1, 160], strides = [1, 1]} : vector<5x160xf32> to vector<1x160xf32>
      %c3_122 = arith.constant 3 : index
      %119 = arith.index_cast %arg14 : i32 to index
      %c0_123 = arith.constant 0 : index
      %120 = vector.load %arg13[%c3_122, %119, %c0_123] : memref<5x8x160xf32, #tpu.memory_space<vmem>>, vector<1x1x160xf32>
      %121 = vector.shape_cast %120 : vector<1x1x160xf32> to vector<1x160xf32>
      %122 = vector.shape_cast %118 : vector<1x160xf32> to vector<1x1x160xf32>
      tpu.vector_store %arg13[%c3_122, %119, %c0_123], %122 {strides = array<i32>} : memref<5x8x160xf32, #tpu.memory_space<vmem>>, vector<1x1x160xf32>,
      %123 = vector.extract_strided_slice %102 {offsets = [4, 0], sizes = [1, 160], strides = [1, 1]} : vector<5x160xf32> to vector<1x160xf32>
      %c4_124 = arith.constant 4 : index
      %124 = arith.index_cast %arg14 : i32 to index
      %c0_125 = arith.constant 0 : index
      %125 = vector.load %arg13[%c4_124, %124, %c0_125] : memref<5x8x160xf32, #tpu.memory_space<vmem>>, vector<1x1x160xf32>
      %126 = vector.shape_cast %125 : vector<1x1x160xf32> to vector<1x160xf32>
      %127 = vector.shape_cast %123 : vector<1x160xf32> to vector<1x1x160xf32>
      tpu.vector_store %arg13[%c4_124, %124, %c0_125], %127 {strides = array<i32>} : memref<5x8x160xf32, #tpu.memory_space<vmem>>, vector<1x1x160xf32>,
    }
    %c8_i32_1 = arith.constant 8 : i32
    %c0_2 = arith.constant 0 : index
    %c0_3 = arith.constant 0 : index
    %c0_4 = arith.constant 0 : index
    %3 = vector.load %arg13[%c0_2, %c0_3, %c0_4] : memref<5x8x160xf32, #tpu.memory_space<vmem>>, vector<1x8x160xf32>
    %4 = vector.shape_cast %3 : vector<1x8x160xf32> to vector<8x160xf32>
    %c0_5 = arith.constant 0 : index
    %c0_6 = arith.constant 0 : index
    %c0_7 = arith.constant 0 : index
    %5 = vector.load %arg8[%c0_5, %c0_6, %c0_7] : memref<5x160x128xf32, #tpu.memory_space<vmem>>, vector<1x160x128xf32>
    %6 = vector.shape_cast %5 : vector<1x160x128xf32> to vector<160x128xf32>
    %cst_8 = arith.constant dense<0.000000e+00> : vector<8x128xf32>
    %7 = tpu.matmul %4, %6, %cst_8 {dimension_numbers = #tpu.dot_dimension_numbers<[1], [0], [0], [1], [0, 0, 1, 1], [], []>} : vector<8x160xf32>, vector<160x128xf32>, vector<8x128xf32> -> vector<8x128xf32>
    %c1 = arith.constant 1 : index
    %c0_9 = arith.constant 0 : index
    %c0_10 = arith.constant 0 : index
    %8 = vector.load %arg13[%c1, %c0_9, %c0_10] : memref<5x8x160xf32, #tpu.memory_space<vmem>>, vector<1x8x160xf32>
    %9 = vector.shape_cast %8 : vector<1x8x160xf32> to vector<8x160xf32>
    %c1_11 = arith.constant 1 : index
    %c0_12 = arith.constant 0 : index
    %c0_13 = arith.constant 0 : index
    %10 = vector.load %arg8[%c1_11, %c0_12, %c0_13] : memref<5x160x128xf32, #tpu.memory_space<vmem>>, vector<1x160x128xf32>
    %11 = vector.shape_cast %10 : vector<1x160x128xf32> to vector<160x128xf32>
    %cst_14 = arith.constant dense<0.000000e+00> : vector<8x128xf32>
    %12 = tpu.matmul %9, %11, %cst_14 {dimension_numbers = #tpu.dot_dimension_numbers<[1], [0], [0], [1], [0, 0, 1, 1], [], []>} : vector<8x160xf32>, vector<160x128xf32>, vector<8x128xf32> -> vector<8x128xf32>
    %13 = arith.addf %7, %12 : vector<8x128xf32>
    %c2 = arith.constant 2 : index
    %c0_15 = arith.constant 0 : index
    %c0_16 = arith.constant 0 : index
    %14 = vector.load %arg13[%c2, %c0_15, %c0_16] : memref<5x8x160xf32, #tpu.memory_space<vmem>>, vector<1x8x160xf32>
    %15 = vector.shape_cast %14 : vector<1x8x160xf32> to vector<8x160xf32>
    %c2_17 = arith.constant 2 : index
    %c0_18 = arith.constant 0 : index
    %c0_19 = arith.constant 0 : index
    %16 = vector.load %arg8[%c2_17, %c0_18, %c0_19] : memref<5x160x128xf32, #tpu.memory_space<vmem>>, vector<1x160x128xf32>
    %17 = vector.shape_cast %16 : vector<1x160x128xf32> to vector<160x128xf32>
    %cst_20 = arith.constant dense<0.000000e+00> : vector<8x128xf32>
    %18 = tpu.matmul %15, %17, %cst_20 {dimension_numbers = #tpu.dot_dimension_numbers<[1], [0], [0], [1], [0, 0, 1, 1], [], []>} : vector<8x160xf32>, vector<160x128xf32>, vector<8x128xf32> -> vector<8x128xf32>
    %19 = arith.addf %13, %18 : vector<8x128xf32>
    %c3 = arith.constant 3 : index
    %c0_21 = arith.constant 0 : index
    %c0_22 = arith.constant 0 : index
    %20 = vector.load %arg13[%c3, %c0_21, %c0_22] : memref<5x8x160xf32, #tpu.memory_space<vmem>>, vector<1x8x160xf32>
    %21 = vector.shape_cast %20 : vector<1x8x160xf32> to vector<8x160xf32>
    %c3_23 = arith.constant 3 : index
    %c0_24 = arith.constant 0 : index
    %c0_25 = arith.constant 0 : index
    %22 = vector.load %arg8[%c3_23, %c0_24, %c0_25] : memref<5x160x128xf32, #tpu.memory_space<vmem>>, vector<1x160x128xf32>
    %23 = vector.shape_cast %22 : vector<1x160x128xf32> to vector<160x128xf32>
    %cst_26 = arith.constant dense<0.000000e+00> : vector<8x128xf32>
    %24 = tpu.matmul %21, %23, %cst_26 {dimension_numbers = #tpu.dot_dimension_numbers<[1], [0], [0], [1], [0, 0, 1, 1], [], []>} : vector<8x160xf32>, vector<160x128xf32>, vector<8x128xf32> -> vector<8x128xf32>
    %25 = arith.addf %19, %24 : vector<8x128xf32>
    %c4 = arith.constant 4 : index
    %c0_27 = arith.constant 0 : index
    %c0_28 = arith.constant 0 : index
    %26 = vector.load %arg13[%c4, %c0_27, %c0_28] : memref<5x8x160xf32, #tpu.memory_space<vmem>>, vector<1x8x160xf32>
    %27 = vector.shape_cast %26 : vector<1x8x160xf32> to vector<8x160xf32>
    %c4_29 = arith.constant 4 : index
    %c0_30 = arith.constant 0 : index
    %c0_31 = arith.constant 0 : index
    %28 = vector.load %arg8[%c4_29, %c0_30, %c0_31] : memref<5x160x128xf32, #tpu.memory_space<vmem>>, vector<1x160x128xf32>
    %29 = vector.shape_cast %28 : vector<1x160x128xf32> to vector<160x128xf32>
    %cst_32 = arith.constant dense<0.000000e+00> : vector<8x128xf32>
    %30 = tpu.matmul %27, %29, %cst_32 {dimension_numbers = #tpu.dot_dimension_numbers<[1], [0], [0], [1], [0, 0, 1, 1], [], []>} : vector<8x160xf32>, vector<160x128xf32>, vector<8x128xf32> -> vector<8x128xf32>
    %31 = arith.addf %25, %30 : vector<8x128xf32>
    %c0_33 = arith.constant 0 : index
    %c0_34 = arith.constant 0 : index
    %32 = vector.load %arg9[%c0_33, %c0_34] : memref<1x128xf32, #tpu.memory_space<vmem>>, vector<1x128xf32>
    %33 = vector.broadcast %32 : vector<1x128xf32> to vector<8x128xf32>
    %34 = arith.addf %31, %33 : vector<8x128xf32>
    %c0_35 = arith.constant 0 : index
    %c0_36 = arith.constant 0 : index
    %35 = vector.load %arg10[%c0_35, %c0_36] : memref<8x128xf32, #tpu.memory_space<vmem>>, vector<8x128xf32>
    tpu.vector_store %arg10[%c0_35, %c0_36], %34 {strides = array<i32>} : memref<8x128xf32, #tpu.memory_space<vmem>>, vector<8x128xf32>,
    return
  }
  func.func @transform_0(%arg0: i32) -> (i32, i32, i32, i32) {
    %c0_i32 = arith.constant 0 : i32
    %c0_i32_0 = arith.constant 0 : i32
    %c0_i32_1 = arith.constant 0 : i32
    %c0_i32_2 = arith.constant 0 : i32
    return %arg0, %c0_i32, %c0_i32_0, %c0_i32_1 : i32, i32, i32, i32
  }
  func.func @transform_1(%arg0: i32) -> (i32, i32, i32) {
    %c0_i32 = arith.constant 0 : i32
    %c0_i32_0 = arith.constant 0 : i32
    %c0_i32_1 = arith.constant 0 : i32
    %c0_i32_2 = arith.constant 0 : i32
    return %c0_i32, %c0_i32_0, %c0_i32_1 : i32, i32, i32
  }
  func.func @transform_2(%arg0: i32) -> (i32, i32) {
    %c0_i32 = arith.constant 0 : i32
    %c0_i32_0 = arith.constant 0 : i32
    %c0_i32_1 = arith.constant 0 : i32
    return %c0_i32, %c0_i32_0 : i32, i32
  }
  func.func @transform_3(%arg0: i32) -> (i32, i32) {
    %c0_i32 = arith.constant 0 : i32
    %c0_i32_0 = arith.constant 0 : i32
    %c0_i32_1 = arith.constant 0 : i32
    return %c0_i32, %c0_i32_0 : i32, i32
  }
  func.func @transform_4(%arg0: i32) -> (i32, i32, i32) {
    %c0_i32 = arith.constant 0 : i32
    %c0_i32_0 = arith.constant 0 : i32
    %c0_i32_1 = arith.constant 0 : i32
    %c0_i32_2 = arith.constant 0 : i32
    return %c0_i32, %c0_i32_0, %c0_i32_1 : i32, i32, i32
  }
  func.func @transform_5(%arg0: i32) -> (i32, i32) {
    %c0_i32 = arith.constant 0 : i32
    %c0_i32_0 = arith.constant 0 : i32
    %c0_i32_1 = arith.constant 0 : i32
    return %c0_i32, %c0_i32_0 : i32, i32
  }
  func.func @transform_6(%arg0: i32) -> (i32, i32) {
    %c0_i32 = arith.constant 0 : i32
    %c0_i32_0 = arith.constant 0 : i32
    %c0_i32_1 = arith.constant 0 : i32
    return %c0_i32, %c0_i32_0 : i32, i32
  }
  func.func @transform_7(%arg0: i32) -> (i32, i32, i32) {
    %c0_i32 = arith.constant 0 : i32
    %c0_i32_0 = arith.constant 0 : i32
    %c0_i32_1 = arith.constant 0 : i32
    %c0_i32_2 = arith.constant 0 : i32
    return %c0_i32, %c0_i32_0, %c0_i32_1 : i32, i32, i32
  }
  func.func @transform_8(%arg0: i32) -> (i32, i32) {
    %c0_i32 = arith.constant 0 : i32
    %c0_i32_0 = arith.constant 0 : i32
    %c0_i32_1 = arith.constant 0 : i32
    return %c0_i32, %c0_i32_0 : i32, i32
  }
  func.func @transform_9(%arg0: i32) -> (i32, i32) {
    %c0_i32 = arith.constant 0 : i32
    %c0_i32_0 = arith.constant 0 : i32
    return %arg0, %c0_i32 : i32, i32
  }
}

</mosaic_0001>

<bundles_post_ra>
// kernel: lenet_forward.1
= control target key start
LH: loop header
LB: loop body
LE: loop exit
PB: predicated region body
PF: predicated region fallthrough
CT: control target
= control target key end

     0   :  { %vm32_vm0 = vcmask 228352   ;;  %v1598_v0 = vmov 0.0   ;;  %s1653_s30 = smov 0   ;;  %s2542_s0 = inlined_call_operand.vmem [shape: f32[8,1,28,28], index: 0, kind: input, shape index: {}]   ;;  %s2543_s1 = inlined_call_operand.vmem [shape: f32[5,28,112], index: 1, kind: input, shape index: {}]   ;;  %s2544_s2 = inlined_call_operand.vmem [shape: f32[1,112], index: 2, kind: input, shape index: {}]   ;;  %s2545_s3 = inlined_call_operand.vmem [shape: f32[14,28], index: 3, kind: input, shape index: {}]   ;;  %s2546_s4 = inlined_call_operand.vmem [shape: f32[5,112,160], index: 4, kind: input, shape index: {}]   ;;  %s2547_s5 = inlined_call_operand.vmem [shape: f32[1,160], index: 5, kind: input, shape index: {}]   ;;  %s2548_s6 = inlined_call_operand.vmem [shape: f32[5,10], index: 6, kind: input, shape index: {}]   ;;  %s2549_s7 = inlined_call_operand.vmem [shape: f32[5,160,128], index: 7, kind: input, shape index: {}]   ;;  %s2550_s8 = inlined_call_operand.vmem [shape: f32[1,128], index: 8, kind: input, shape index: {}]   ;;  %s2551_s9 = inlined_call_operand.vmem [shape: f32[8,128], index: 9, kind: output, shape index: {}]  }
   0x1   :  { %33 = vst.msk [vmem:[#allocation2] sm:$0xff] %vm32_vm0, %v1598_v0 }
   0x2   :  { %34 = vst.msk [vmem:[#allocation2 + $0x8] sm:$0xff] %vm32_vm0, %v1598_v0 }
   0x3   :  { %35 = vst.msk [vmem:[#allocation2 + $0x10] sm:$0xff] %vm32_vm0, %v1598_v0 }
   0x4   :  { %36 = vst.msk [vmem:[#allocation2 + $0x18] sm:$0xff] %vm32_vm0, %v1598_v0 }
   0x5 LB: > { %v1306_v1 = vld [vmem:[%s2543_s1 + $0x38] sm:$0xf]  ;;  %vm83_vm1 = vcmask 1043456   ;;  %v1305_v3 = vld [vmem:[%s2543_s1 + $0x30] sm:$0xff]  ;;  %v1304_v8 = vld [vmem:[%s2543_s1 + $0x28] sm:$0xff]  ;;  %s1302_s28 = sshll.u32 %s1596_s30, 5  ;;  %s1596_s30 = sphi %s1653_s30, %s42_s30  }
   0x6   : > { %v61_v2 = vld [vmem:[%s2543_s1 + $0x18] sm:$0xf]  ;;  %1307 = vmatpush.msk.msra.mxu0 %vm83_vm1, %v1306_v1  ;;  %v60_v5 = vld [vmem:[%s2543_s1 + $0x10] sm:$0xff]  ;;  %v59_v9 = vld [vmem:[%s2543_s1 + $0x8] sm:$0xff]  ;;  %s44_s15 = scalar_lea.vmem %s2542_s0, %s1302_s28  ;;  %vm52_vm2 = vcmask 224256   ;;  %vm377_vm3 = vcmask 916480  }
   0x7   : > { %1312 = vmatpush.msk.msra.mxu1 %vm83_vm1, %v61_v2  ;;  %v1320_v4 = vld [vmem:[%s2543_s1 + $0x58] sm:$0xf]  ;;  %v1319_v6 = vld [vmem:[%s2543_s1 + $0x50] sm:$0xff]  ;;  %v1318_v10 = vld [vmem:[%s2543_s1 + $0x48] sm:$0xff]  ;;  %vm379_vm4 = vcmask 914432   ;;  %vm826_vm5 = vcmask 1041408  }
   0x8   : > { %1321 = vmatpush.msk.msra.mxu2 %vm83_vm1, %v1320_v4  ;;  %v1329_v7 = vld [vmem:[%s2543_s1 + $0x78] sm:$0xf]  ;;  %100 = vmatpush.msra.mxu0 %v1305_v3  ;;  %v1328_v11 = vld [vmem:[%s2543_s1 + $0x70] sm:$0xff]  ;;  %v1303_v12 = vld [vmem:[%s2543_s1 + $0x20] sm:$0xff]  ;;  %vm822_vm6 = vcmask 80896   ;;  %s883_s24 = sshra.s32 %s1596_s30, 3 }
   0x9   : > { %144 = vmatpush.msra.mxu1 %v60_v5  ;;  %1330 = vmatpush.msk.msra.mxu3 %vm83_vm1, %v1329_v7  ;;  %v58_v13 = vld [vmem:[%s2543_s1] sm:$0xff]  ;;  %v1327_v15 = vld [vmem:[%s2543_s1 + $0x68] sm:$0xff]  ;;  %v47_v18 = vld [vmem:[%s44_s15 + $0x10] sm:$0xff]  ;;  %s886_s25 = sand.u32 7, %s1596_s30  ;;  %s1578_s26 = sshll.u32 %s883_s24, 4  ;;  %vm876_vm7 = vcmask 1040384  }
   0xa   : > { %197 = vmatpush.msra.mxu2 %v1319_v6  ;;  %v1317_v14 = vld [vmem:[%s2543_s1 + $0x40] sm:$0xff]  ;;  %101 = vmatpush.msra.mxu0 %v1304_v8  ;;  %v46_v17 = vld [vmem:[%s44_s15 + $0x8] sm:$0xff]  ;;  %v48_v19 = vld [vmem:[%s44_s15 + $0x18] sm:$0xf]  ;;  %51 = vst.msk [vmem:[#allocation2 + $0x12] sm:$0xff] %vm32_vm0, %v47_v18  ;;  %s889_s27 = sadd.s32 %s1578_s26, %s886_s25  ;;  %s42_s30 = sadd.s32 1, %s1596_s30  }
   0xb   : > { %145 = vmatpush.msra.mxu1 %v59_v9  ;;  %v45_v16 = vld [vmem:[%s44_s15] sm:$0xff]  ;;  %254 = vmatpush.msra.mxu3 %v1328_v11  ;;  %50 = vst.msk [vmem:[#allocation2 + $0xa] sm:$0xff] %vm32_vm0, %v46_v17  ;;  %v1338_v21 = vld [vmem:[%s2543_s1 + $0x98] sm:$0xf]  ;;  %v1337_v22 = vld [vmem:[%s2543_s1 + $0x90] sm:$0xff]  ;;  %s890_s28 = scalar_lea.vmem [#allocation4], %s889_s27 }
   0xc   : > { %198 = vmatpush.msra.mxu2 %v1318_v10  ;;  %49 = vst.msk [vmem:[#allocation2 + $0x2] sm:$0xff] %vm32_vm0, %v45_v16  ;;  %102 = vmatpush.msra.mxu0 %v1303_v12  ;;  %v1326_v20 = vld [vmem:[%s2543_s1 + $0x60] sm:$0xff]  ;;  %v1336_v23 = vld [vmem:[%s2543_s1 + $0x88] sm:$0xff]  ;;  %v1373_v61 = vld [vmem:[%s2546_s4 + $0x1b0] sm:$0xff]  ;;  %p39_p0 = scmp.ge.s32.totalorder %s42_s30, 8  }
   0xd   : > { %146 = vmatpush.msra.mxu1 %v58_v13  ;;  %255 = vmatpush.msra.mxu3 %v1327_v15  ;;  %53 = vst.msk [vmem:[#allocation2 + $0x1a] sm:$0xf] %vm52_vm2, %v48_v19  ;;  %v1335_v24 = vld [vmem:[%s2543_s1 + $0x80] sm:$0xff]  ;;  %v1374_v62 = vld [vmem:[%s2546_s4 + $0x1b8] sm:$0xff]  ;;  %v1372_v1 = vld [vmem:[%s2546_s4 + $0x1a8] sm:$0xff]  ;;  %vm975_vm9 = vcmask (%p39_p0), 261120  }
   0xe   : > { %199 = vmatpush.msra.mxu2 %v1317_v14  ;;  %1339 = vmatpush.msk.msrb.mxu0 %vm83_vm1, %v1338_v21  ;;  %v1371_v63 = vld [vmem:[%s2546_s4 + $0x1a0] sm:$0xff]  ;;  %v1369_v4 = vld [vmem:[%s2546_s4 + $0x190] sm:$0xff]  ;;  %v1370_v5 = vld [vmem:[%s2546_s4 + $0x198] sm:$0xff] }
   0xf   : > { %256 = vmatpush.msra.mxu3 %v1326_v20  ;;  %v1367_v9 = vld [vmem:[%s2546_s4 + $0x180] sm:$0xff]  ;;  %v1368_v10 = vld [vmem:[%s2546_s4 + $0x188] sm:$0xff]  ;;  %v1410_v14 = vld [vmem:[%s2546_s4 + $0x298] sm:$0xff] }
  0x10   : > { %311 = vmatpush.msrb.mxu0 %v1337_v22  ;;  %450 = vmatpush.msrb.mxu2 %v1373_v61  ;;  %v1365_v16 = vld [vmem:[%s2546_s4 + $0x170] sm:$0xff]  ;;  %v1366_v17 = vld [vmem:[%s2546_s4 + $0x178] sm:$0xff]  ;;  %v1408_v20 = vld [vmem:[%s2546_s4 + $0x288] sm:$0xff] }
  0x11   : > { %v162_v35 = vld [vmem:[#allocation2 + $0x12] sm:$0xff]  ;;  %473 = vmatpush.msrb.mxu3 %v1374_v62  ;;  %v1364_v22 = vld [vmem:[%s2546_s4 + $0x168] sm:$0xff]  ;;  %v1349_v61 = vld [vmem:[%s2546_s4 + $0xf0] sm:$0xff] }
  0x12   : > { %312 = vmatpush.msrb.mxu0 %v1336_v23  ;;  %v161_v31 = vld [vmem:[#allocation2 + $0xa] sm:$0xff]  ;;  %451 = vmatpush.msrb.mxu2 %v1371_v63  ;;  %v1363_v21 = vld [vmem:[%s2546_s4 + $0x160] sm:$0xff]  ;;  %v1392_v63 = vld [vmem:[%s2546_s4 + $0x208] sm:$0xff] }
  0x13   : > { %v62_v25 = vld [vmem:[#allocation2 + $0x1] sm:$0xff]  ;;  %v63_v29 = vld [vmem:[#allocation2 + $0x9] sm:$0xff]  ;;  %v64_v33 = vld [vmem:[#allocation2 + $0x11] sm:$0xff]  ;;  %474 = vmatpush.msrb.mxu3 %v1372_v1 }
  0x14   : > { %v54_v26 = vld [vmem:[#allocation2] sm:$0xff]  ;;  %1308 = vmatmul.msk.f32.vlgmr.msra.gmra.mxu0 %vm32_vm0, %v62_v25  ;;  %v55_v30 = vld [vmem:[#allocation2 + $0x8] sm:$0xff]  ;;  %v56_v34 = vld [vmem:[#allocation2 + $0x10] sm:$0xff]  ;;  %452 = vmatpush.msrb.mxu2 %v1369_v4 }
  0x15   : > { %v160_v27 = vld [vmem:[#allocation2 + $0x2] sm:$0xff]  ;;  %1313 = vmatmul.msk.f32.vlgmr.msra.gmra.mxu1 %vm32_vm0, %v54_v26  ;;  %313 = vmatpush.msrb.mxu0 %v1335_v24  ;;  %v218_v32 = vld [vmem:[#allocation2 + $0xb] sm:$0xff]  ;;  %v219_v36 = vld [vmem:[#allocation2 + $0x13] sm:$0xff] }
  0x16   : > { %v217_v28 = vld [vmem:[#allocation2 + $0x3] sm:$0xff]  ;;  %1322 = vmatmul.msk.f32.vlgmr.msra.gmra.mxu2 %vm32_vm0, %v160_v27  ;;  %v65_v37 = vld [vmem:[#allocation2 + $0x19] sm:$0xf]  ;;  %v275_v42 = vld [vmem:[#allocation2 + $0xc] sm:$0xff]  ;;  %475 = vmatpush.msrb.mxu3 %v1370_v5 }
  0x17   : > { %1331 = vmatmul.msk.f32.vlgmr.msra.gmra.mxu3 %vm32_vm0, %v217_v28  ;;  %v57_v38 = vld [vmem:[#allocation2 + $0x18] sm:$0xf]  ;;  %v274_v41 = vld [vmem:[#allocation2 + $0x4] sm:$0xff]  ;;  %v277_v44 = vld [vmem:[#allocation2 + $0x1c] sm:$0xf]  ;;  %608 = vmatpush.msra.mxu0 %v1410_v14 }
  0x18   : > { %v163_v39 = vld [vmem:[#allocation2 + $0x1a] sm:$0xf]  ;;  %453 = vmatpush.msrb.mxu2 %v1367_v9  ;;  %476 = vmatpush.msrb.mxu3 %v1368_v10  ;;  %v1406_v23 = vld [vmem:[%s2546_s4 + $0x278] sm:$0xff]  ;;  %v1404_v27 = vld [vmem:[%s2546_s4 + $0x268] sm:$0xff] }
  0x19   : > { %v220_v40 = vld [vmem:[#allocation2 + $0x1b] sm:$0xf]  ;;  %609 = vmatpush.msra.mxu0 %v1408_v20  ;;  %v1350_v62 = vld [vmem:[%s2546_s4 + $0xf8] sm:$0xff]  ;;  %v405_v4 = vld [vmem:[%s2546_s4 + $0xb0] sm:$0xff] }
  0x1a   : > { %v276_v43 = vld [vmem:[#allocation2 + $0x14] sm:$0xff]  ;;  %454 = vmatpush.msrb.mxu2 %v1365_v16  ;;  %477 = vmatpush.msrb.mxu3 %v1366_v17  ;;  %v1409_v5 = vld [vmem:[%s2546_s4 + $0x290] sm:$0xff]  ;;  %v344_v10 = vld [vmem:[%s2545_s3 + $0x8] sm:$0x3f] }
  0x1b   : > { %610 = vmatpush.msra.mxu0 %v1406_v23  ;;  %v1347_v1 = vld [vmem:[%s2546_s4 + $0xe0] sm:$0xff]  ;;  %v393_v17 = vld [vmem:[%s2546_s4 + $0x50] sm:$0xff] }
  0x1c   : > { %1309 = vmatmul.msk.f32.gmra.mxu0 %vm32_vm0, %v63_v29  ;;  %v1361_v29 = vld [vmem:[%s2546_s4 + $0x150] sm:$0xff]  ;;  %455 = vmatpush.msrb.mxu2 %v1363_v21  ;;  %v1407_v9 = vld [vmem:[%s2546_s4 + $0x280] sm:$0xff] }
  0x1d   : > { %1314 = vmatmul.msk.f32.gmra.mxu1 %vm32_vm0, %v55_v30  ;;  %v1362_v30 = vld [vmem:[%s2546_s4 + $0x158] sm:$0xff]  ;;  %478 = vmatpush.msrb.mxu3 %v1364_v22  ;;  %v399_v14 = vld [vmem:[%s2546_s4 + $0x80] sm:$0xff]  ;;  %v385_v21 = vld [vmem:[%s2546_s4 + $0x10] sm:$0xff] }
  0x1e   : > { %1323 = vmatmul.msk.f32.gmra.mxu2 %vm32_vm0, %v161_v31  ;;  %611 = vmatpush.msra.mxu0 %v1404_v27  ;;  %v395_v16 = vld [vmem:[%s2546_s4 + $0x60] sm:$0xff]  ;;  %v1441_v23 = vld [vmem:[%s2546_s4 + $0x370] sm:$0xff]  ;;  %v1388_v27 = vld [vmem:[%s2546_s4 + $0x1e8] sm:$0xff] }
  0x1f   : > { %1332 = vmatmul.msk.f32.gmra.mxu3 %vm32_vm0, %v218_v32  ;;  %456 = vmatpush.msrb.mxu2 %v1361_v29  ;;  %v387_v20 = vld [vmem:[%s2546_s4 + $0x20] sm:$0xff]  ;;  %v402_v29 = vld [vmem:[%s2546_s4 + $0x98] sm:$0xff] }
  0x20   : > { %479 = vmatpush.msrb.mxu3 %v1362_v30  ;;  %v383_v22 = vld [vmem:[%s2546_s4] sm:$0xff]  ;;  %v1401_v30 = vld [vmem:[%s2546_s4 + $0x250] sm:$0xff] }
  0x24   : > { %1310 = vmatmul.msk.f32.gmra.mxu0 %vm32_vm0, %v64_v33 }
  0x25   : > { %1315 = vmatmul.msk.f32.gmra.mxu1 %vm32_vm0, %v56_v34  ;;  %v1588_v34 = vld [vmem:[%s2544_s2] ss:$0 sm:$0xff] }
  0x26   : > { %1324 = vmatmul.msk.f32.gmra.mxu2 %vm32_vm0, %v162_v35  ;;  %v1402_v35 = vld [vmem:[%s2546_s4 + $0x258] sm:$0xff] }
  0x27   : > { %1333 = vmatmul.msk.f32.gmra.mxu3 %vm32_vm0, %v219_v36  ;;  %v1359_v36 = vld [vmem:[%s2546_s4 + $0x140] sm:$0xff]  ;;  %612 = vmatpush.msra.mxu0 %v1402_v35  ;;  %v1384_v35 = vld [vmem:[%s2546_s4 + $0x1c8] sm:$0xff] }
  0x28   : > { %457 = vmatpush.msrb.mxu2 %v1359_v36  ;;  %v1433_v36 = vld [vmem:[%s2546_s4 + $0x330] sm:$0xff] }
  0x2c   : > { %1311 = vmatmul.msk.f32.gmra.mxu0 %vm32_vm0, %v65_v37  ;;  %v1360_v37 = vld [vmem:[%s2546_s4 + $0x148] sm:$0xff] }
  0x2d   : > { %1316 = vmatmul.msk.f32.gmra.mxu1 %vm32_vm0, %v57_v38  ;;  %480 = vmatpush.msrb.mxu3 %v1360_v37  ;;  %v1474_v37 = vld [vmem:[%s2546_s4 + $0x458] sm:$0xff] }
  0x2e   : > { %1325 = vmatmul.msk.f32.gmra.mxu2 %vm32_vm0, %v163_v39 }
  0x2f   : > { %1334 = vmatmul.msk.f32.gmra.mxu3 %vm32_vm0, %v220_v40 }
  0x34   : > { %1340 = vmatmul.msk.f32.vlgmr.msrb.gmra.mxu0 %vm32_vm0, %v274_v41  ;;  %v1400_v41 = vld [vmem:[%s2546_s4 + $0x248] sm:$0xff] }
  0x35   : > { %613 = vmatpush.msra.mxu0 %v1400_v41  ;;  %v1472_v41 = vld [vmem:[%s2546_s4 + $0x448] sm:$0xff] }
  0x3c   : > { %1341 = vmatmul.msk.f32.gmra.mxu0 %vm32_vm0, %v275_v42  ;;  %v1357_v42 = vld [vmem:[%s2546_s4 + $0x130] sm:$0xff] }
  0x3d   : > { %458 = vmatpush.msrb.mxu2 %v1357_v42  ;;  %v396_v42 = vld [vmem:[%s2546_s4 + $0x68] sm:$0xff] }
  0x44   : > { %1342 = vmatmul.msk.f32.gmra.mxu0 %vm32_vm0, %v276_v43 }
  0x4c   : > { %1343 = vmatmul.msk.f32.gmra.mxu0 %vm32_vm0, %v277_v44 }
  0x91   : > { %v104_v45 = vpop.f32.mrf.mxu0 }
  0x92   : > { %v148_v47 = vpop.f32.mrf.mxu1 }
  0x93   : > { %v149_v11 = vadd.f32 %v148_v47, %v104_v45  ;;  %v1358_v45 = vld [vmem:[%s2546_s4 + $0x138] sm:$0xff]  ;;  %v1355_v47 = vld [vmem:[%s2546_s4 + $0x120] sm:$0xff] }
  0x94   : > { %481 = vmatpush.msrb.mxu3 %v1358_v45  ;;  %459 = vmatpush.msrb.mxu2 %v1355_v47  ;;  %v1470_v45 = vld [vmem:[%s2546_s4 + $0x438] sm:$0xff]  ;;  %v1393_v47 = vld [vmem:[%s2546_s4 + $0x210] sm:$0xff] }
  0x99   : > { %v107_v46 = vpop.f32.mrf.mxu0  ;;  %v201_v49 = vpop.f32.mrf.mxu2 }
  0x9a   : > { %v258_v50 = vpop.f32.mrf.mxu3  ;;  %v151_v52 = vpop.f32.mrf.mxu1  ;;  %v213_v18 = vadd.f32 %v201_v49, %v149_v11  ;;  %v406_v11 = vld [vmem:[%s2546_s4 + $0xb8] sm:$0xff] }
  0x9b   : > { %v152_v6 = vadd.f32 %v151_v52, %v107_v46  ;;  %v1398_v46 = vld [vmem:[%s2546_s4 + $0x238] sm:$0xff]  ;;  %v1353_v52 = vld [vmem:[%s2546_s4 + $0x110] sm:$0xff] }
  0x9c   : > { %v270_v31 = vadd.f32 %v258_v50, %v213_v18  ;;  %v1356_v50 = vld [vmem:[%s2546_s4 + $0x128] sm:$0xff]  ;;  %614 = vmatpush.msra.mxu0 %v1398_v46  ;;  %460 = vmatpush.msrb.mxu2 %v1353_v52  ;;  %v391_v18 = vld [vmem:[%s2546_s4 + $0x40] sm:$0xff]  ;;  %v394_v46 = vld [vmem:[%s2546_s4 + $0x58] sm:$0xff] }
  0x9d   : > { %482 = vmatpush.msrb.mxu3 %v1356_v50  ;;  %v392_v50 = vld [vmem:[%s2546_s4 + $0x48] sm:$0xff]  ;;  %v1425_v52 = vld [vmem:[%s2546_s4 + $0x2f0] sm:$0xff] }
  0xa1   : > { %v110_v48 = vpop.f32.mrf.mxu0  ;;  %v204_v53 = vpop.f32.mrf.mxu2 }
  0xa2   : > { %v261_v54 = vpop.f32.mrf.mxu3  ;;  %v154_v56 = vpop.f32.mrf.mxu1  ;;  %v214_v12 = vadd.f32 %v204_v53, %v152_v6  ;;  %v408_v6 = vld [vmem:[%s2546_s4 + $0xc8] sm:$0xff] }
  0xa3   : > { %v155_v0 = vadd.f32 %v154_v56, %v110_v48  ;;  %v1351_v56 = vld [vmem:[%s2546_s4 + $0x100] sm:$0xff] }
  0xa4   : > { %v271_v24 = vadd.f32 %v261_v54, %v214_v12  ;;  %v1354_v54 = vld [vmem:[%s2546_s4 + $0x118] sm:$0xff]  ;;  %461 = vmatpush.msrb.mxu2 %v1351_v56  ;;  %v401_v12 = vld [vmem:[%s2546_s4 + $0x90] sm:$0xff]  ;;  %v1423_v56 = vld [vmem:[%s2546_s4 + $0x2e0] sm:$0xff] }
  0xa5   : > { %483 = vmatpush.msrb.mxu3 %v1354_v54  ;;  %v390_v54 = vld [vmem:[%s2546_s4 + $0x38] sm:$0xff] }
  0xa6   : > { %462 = vmatpush.msrb.mxu2 %v1349_v61  ;;  %v1462_v61 = vld [vmem:[%s2546_s4 + $0x3f8] sm:$0xff] }
  0xa8   : > { %463 = vmatpush.msrb.mxu2 %v1347_v1  ;;  %v1460_v1 = vld [vmem:[%s2546_s4 + $0x3e8] sm:$0xff] }
  0xa9   : > { %v113_v51 = vpop.f32.mrf.mxu0  ;;  %v207_v57 = vpop.f32.mrf.mxu2 }
  0xaa   : > { %v264_v59 = vpop.f32.mrf.mxu3  ;;  %v157_v60 = vpop.f32.mrf.mxu1  ;;  %v215_v7 = vadd.f32 %v207_v57, %v155_v0  ;;  %v407_v0 = vld [vmem:[%s2546_s4 + $0xc0] sm:$0xff] }
  0xab   : > { %v158_v8 = vadd.f32 %v157_v60, %v113_v51  ;;  %v1396_v51 = vld [vmem:[%s2546_s4 + $0x228] sm:$0xff]  ;;  %v409_v60 = vld [vmem:[%s2546_s4 + $0xd0] sm:$0xff] }
  0xac   : > { %v272_v19 = vadd.f32 %v264_v59, %v215_v7  ;;  %615 = vmatpush.msra.mxu0 %v1396_v51  ;;  %v1352_v59 = vld [vmem:[%s2546_s4 + $0x108] sm:$0xff]  ;;  %v1390_v7 = vld [vmem:[%s2546_s4 + $0x1f8] sm:$0xff]  ;;  %v1391_v51 = vld [vmem:[%s2546_s4 + $0x200] sm:$0xff] }
  0xad   : > { %484 = vmatpush.msrb.mxu3 %v1352_v59  ;;  %v1387_v59 = vld [vmem:[%s2546_s4 + $0x1e0] sm:$0xff] }
  0xaf   : > { %485 = vmatpush.msrb.mxu3 %v1350_v62  ;;  %v386_v62 = vld [vmem:[%s2546_s4 + $0x18] sm:$0xff] }
  0xb1   : > { %v1750_v55 = vpop.f32.mrf.mxu0  ;;  %v210_v2 = vpop.f32.mrf.mxu2 }
  0xb2   : > { %v216_v13 = vadd.f32 %v210_v2, %v158_v8  ;;  %v267_v15 = vpop.f32.mrf.mxu3  ;;  %v327_v38 = vadd.f32 %v1750_v55, %v270_v31  ;;  %v1394_v55 = vld [vmem:[%s2546_s4 + $0x218] sm:$0xff]  ;;  %v1348_v2 = vld [vmem:[%s2546_s4 + $0xe8] sm:$0xff]  ;;  %v403_v8 = vld [vmem:[%s2546_s4 + $0xa0] sm:$0xff] }
  0xb3   : > { %616 = vmatpush.msra.mxu0 %v1394_v55  ;;  %486 = vmatpush.msrb.mxu3 %v1348_v2  ;;  %v1386_v31 = vld [vmem:[%s2546_s4 + $0x1d8] sm:$0xff]  ;;  %v1389_v55 = vld [vmem:[%s2546_s4 + $0x1f0] sm:$0xff]  ;;  %v384_v2 = vld [vmem:[%s2546_s4 + $0x8] sm:$0xff] }
  0xb4   : > { %v273_v25 = vadd.f32 %v267_v15, %v216_v13  ;;  %v335_v49 = vadd.f32 %v1588_v34, %v327_v38  ;;  %v1405_v13 = vld [vmem:[%s2546_s4 + $0x270] sm:$0xff]  ;;  %v398_v38 = vld [vmem:[%s2546_s4 + $0x78] sm:$0xff] }
  0xb5   : > { %617 = vmatpush.msra.mxu0 %v1392_v63  ;;  %585 = vmatpush.msra.mxu3 %v1409_v5  ;;  %v397_v15 = vld [vmem:[%s2546_s4 + $0x70] sm:$0xff]  ;;  %v1458_v5 = vld [vmem:[%s2546_s4 + $0x3d8] sm:$0xff] }
  0xb6   : > { %v339_v57 = vmax.f32 %v335_v49, 0.0  ;;  %v1468_v49 = vld [vmem:[%s2546_s4 + $0x428] sm:$0xff]  ;;  %v1385_v63 = vld [vmem:[%s2546_s4 + $0x1d0] sm:$0xff] }
  0xb7   : > { %618 = vmatpush.msra.mxu0 %v1390_v7  ;;  %586 = vmatpush.msra.mxu3 %v1407_v9  ;;  %v1456_v7 = vld [vmem:[%s2546_s4 + $0x3c8] sm:$0xff] }
  0xb8   : > { %v1452_v9 = vld [vmem:[%s2546_s4 + $0x3a8] sm:$0xff] }
  0xb9   : > { %v318_v58 = vpop.f32.mrf.mxu0  ;;  %587 = vmatpush.msra.mxu3 %v1405_v13  ;;  %619 = vmatpush.msra.mxu0 %v1388_v27 }
  0xba   : > { %v328_v32 = vadd.f32 %v318_v58, %v271_v24  ;;  %v343_v58 = vld [vmem:[%s2545_s3] sm:$0xff] }
  0xbb   : > { %v1439_v24 = vld [vmem:[%s2546_s4 + $0x360] sm:$0xff]  ;;  %620 = vmatpush.msra.mxu0 %v1386_v31  ;;  %v1432_v31 = vld [vmem:[%s2546_s4 + $0x328] sm:$0xff] }
  0xbc   : > { %v336_v44 = vadd.f32 %v1588_v34, %v328_v32  ;;  %v1435_v32 = vld [vmem:[%s2546_s4 + $0x340] sm:$0xff] }
  0xbd   : > { %621 = vmatpush.msra.mxu0 %v1384_v35 }
  0xbe   : > { %v340_v53 = vmax.f32 %v336_v44, 0.0  ;;  %v1429_v44 = vld [vmem:[%s2546_s4 + $0x310] sm:$0xff] }
  0xbf   : > { %782 = vmatpush.msrb.mxu0 %v1474_v37  ;;  %v1428_v37 = vld [vmem:[%s2546_s4 + $0x308] sm:$0xff] }
  0xc1   : > { %v321_v3 = vpop.f32.mrf.mxu0  ;;  %783 = vmatpush.msrb.mxu0 %v1472_v41  ;;  %v1424_v41 = vld [vmem:[%s2546_s4 + $0x2e8] sm:$0xff] }
  0xc2   : > { %v329_v26 = vadd.f32 %v321_v3, %v272_v19  ;;  %v410_v3 = vld [vmem:[%s2546_s4 + $0xd8] sm:$0xff]  ;;  %v389_v19 = vld [vmem:[%s2546_s4 + $0x30] sm:$0xff] }
  0xc3   : > { %525 = vmatpush.msra.mxu2 %v410_v3  ;;  %784 = vmatpush.msrb.mxu0 %v1470_v45  ;;  %v1383_v3 = vld [vmem:[%s2546_s4 + $0x1c0] sm:$0xff] }
  0xc4   : > { %v337_v40 = vadd.f32 %v1588_v34, %v329_v26  ;;  %v1403_v26 = vld [vmem:[%s2546_s4 + $0x260] sm:$0xff] }
  0xc5   : > { %526 = vmatpush.msra.mxu2 %v408_v6  ;;  %588 = vmatpush.msra.mxu3 %v1403_v26  ;;  %v1415_v6 = vld [vmem:[%s2546_s4 + $0x2a0] sm:$0xff] }
  0xc6   : > { %v341_v48 = vmax.f32 %v337_v40, 0.0  ;;  %v1431_v40 = vld [vmem:[%s2546_s4 + $0x320] sm:$0xff]  ;;  %785 = vmatpush.msrb.mxu0 %v1468_v49  ;;  %v1449_v49 = vld [vmem:[%s2546_s4 + $0x390] sm:$0xff] }
  0xc7   : > { %527 = vmatpush.msra.mxu2 %v406_v11  ;;  %589 = vmatpush.msra.mxu3 %v1401_v30  ;;  %v1448_v11 = vld [vmem:[%s2546_s4 + $0x388] sm:$0xff]  ;;  %v1467_v26 = vld [vmem:[%s2546_s4 + $0x420] sm:$0xff]  ;;  %v1465_v30 = vld [vmem:[%s2546_s4 + $0x410] sm:$0xff] }
  0xc9   : > { %v324_v28 = vpop.f32.mrf.mxu0 }
  0xca   : > { %v330_v33 = vadd.f32 %v324_v28, %v273_v25  ;;  %v404_v25 = vld [vmem:[%s2546_s4 + $0xa8] sm:$0xff]  ;;  %v1437_v28 = vld [vmem:[%s2546_s4 + $0x350] sm:$0xff] }
  0xcb   : > { %528 = vmatpush.msra.mxu2 %v404_v25  ;;  %v1436_v25 = vld [vmem:[%s2546_s4 + $0x348] sm:$0xff] }
  0xcc   : > { %v338_v39 = vadd.f32 %v1588_v34, %v330_v33  ;;  %v400_v33 = vld [vmem:[%s2546_s4 + $0x88] sm:$0xff]  ;;  %v1399_v34 = vld [vmem:[%s2546_s4 + $0x240] sm:$0xff] }
  0xcd   : > { %529 = vmatpush.msra.mxu2 %v402_v29  ;;  %590 = vmatpush.msra.mxu3 %v1399_v34  ;;  %v1434_v29 = vld [vmem:[%s2546_s4 + $0x338] sm:$0xff]  ;;  %v1461_v34 = vld [vmem:[%s2546_s4 + $0x3f0] sm:$0xff] }
  0xce   : > { %v342_v43 = vmax.f32 %v338_v39, 0.0  ;;  %v1397_v39 = vld [vmem:[%s2546_s4 + $0x230] sm:$0xff] }
  0xcf   : > { %530 = vmatpush.msra.mxu2 %v400_v33  ;;  %591 = vmatpush.msra.mxu3 %v1397_v39  ;;  %v1430_v33 = vld [vmem:[%s2546_s4 + $0x318] sm:$0xff] }
  0xd0   : > { %1344 = vmatpush.msk.msrb.mxu1 %vm83_vm1, %v342_v43  ;;  %v1395_v43 = vld [vmem:[%s2546_s4 + $0x220] sm:$0xff]  ;;  %v1426_v39 = vld [vmem:[%s2546_s4 + $0x2f8] sm:$0xff] }
  0xd1   : > { %531 = vmatpush.msra.mxu2 %v398_v38  ;;  %592 = vmatpush.msra.mxu3 %v1395_v43  ;;  %v1459_v38 = vld [vmem:[%s2546_s4 + $0x3e0] sm:$0xff]  ;;  %v1422_v43 = vld [vmem:[%s2546_s4 + $0x2d8] sm:$0xff] }
  0xd2   : > { %367 = vmatpush.msrb.mxu1 %v341_v48  ;;  %v1427_v48 = vld [vmem:[%s2546_s4 + $0x300] sm:$0xff] }
  0xd3   : > { %532 = vmatpush.msra.mxu2 %v396_v42  ;;  %593 = vmatpush.msra.mxu3 %v1393_v47  ;;  %v1455_v42 = vld [vmem:[%s2546_s4 + $0x3c0] sm:$0xff] }
  0xd4   : > { %368 = vmatpush.msrb.mxu1 %v340_v53  ;;  %v1466_v53 = vld [vmem:[%s2546_s4 + $0x418] sm:$0xff]  ;;  %v1451_v47 = vld [vmem:[%s2546_s4 + $0x3a0] sm:$0xff] }
  0xd5   : > { %533 = vmatpush.msra.mxu2 %v394_v46  ;;  %594 = vmatpush.msra.mxu3 %v1391_v51  ;;  %v1420_v46 = vld [vmem:[%s2546_s4 + $0x2c8] sm:$0xff]  ;;  %v1447_v51 = vld [vmem:[%s2546_s4 + $0x380] sm:$0xff] }
  0xd6   : > { %369 = vmatpush.msrb.mxu1 %v339_v57  ;;  %v1464_v57 = vld [vmem:[%s2546_s4 + $0x408] sm:$0xff]  ;;  %786 = vmatpush.msrb.mxu0 %v1466_v53 }
  0xd7   : > { %1345 = vmatmul.msk.f32.vlgmr.msrb.gmra.mxu1 %vm32_vm0, %v343_v58  ;;  %534 = vmatpush.msra.mxu2 %v392_v50  ;;  %v388_v58 = vld [vmem:[%s2546_s4 + $0x28] sm:$0xff] }
  0xd8   : > { %502 = vmatpush.msra.mxu1 %v409_v60  ;;  %595 = vmatpush.msra.mxu3 %v1389_v55  ;;  %v1421_v60 = vld [vmem:[%s2546_s4 + $0x2d0] sm:$0xff]  ;;  %v1416_v50 = vld [vmem:[%s2546_s4 + $0x2a8] sm:$0xff] }
  0xd9   : > { %535 = vmatpush.msra.mxu2 %v390_v54  ;;  %787 = vmatpush.msrb.mxu0 %v1464_v57 }
  0xda   : > { %503 = vmatpush.msra.mxu1 %v407_v0  ;;  %596 = vmatpush.msra.mxu3 %v1387_v59  ;;  %v1419_v0 = vld [vmem:[%s2546_s4 + $0x2c0] sm:$0xff] }
  0xdb   : > { %536 = vmatpush.msra.mxu2 %v388_v58  ;;  %788 = vmatpush.msrb.mxu0 %v1462_v61 }
  0xdc   : > { %504 = vmatpush.msra.mxu1 %v405_v4  ;;  %v1417_v4 = vld [vmem:[%s2546_s4 + $0x2b0] sm:$0xff]  ;;  %597 = vmatpush.msra.mxu3 %v1385_v63 }
  0xdd   : > { %537 = vmatpush.msra.mxu2 %v386_v62  ;;  %789 = vmatpush.msrb.mxu0 %v1460_v1 }
  0xde   : > { %505 = vmatpush.msra.mxu1 %v403_v8  ;;  %598 = vmatpush.msra.mxu3 %v1383_v3  ;;  %v1454_v8 = vld [vmem:[%s2546_s4 + $0x3b8] sm:$0xff] }
  0xdf   : > { %1346 = vmatmul.msk.f32.gmra.mxu1 %vm32_vm0, %v344_v10  ;;  %538 = vmatpush.msra.mxu2 %v384_v2  ;;  %v1450_v10 = vld [vmem:[%s2546_s4 + $0x398] sm:$0xff] }
  0xe0   : > { %506 = vmatpush.msra.mxu1 %v401_v12  ;;  %790 = vmatpush.msrb.mxu0 %v1458_v5 }
  0xe2   : > { %507 = vmatpush.msra.mxu1 %v399_v14  ;;  %791 = vmatpush.msrb.mxu0 %v1456_v7 }
  0xe4   : > { %508 = vmatpush.msra.mxu1 %v397_v15  ;;  %792 = vmatpush.msrb.mxu0 %v1454_v8  ;;  %v1442_v15 = vld [vmem:[%s2546_s4 + $0x378] sm:$0xff] }
  0xe6   : > { %509 = vmatpush.msra.mxu1 %v395_v16  ;;  %793 = vmatpush.msrb.mxu0 %v1452_v9  ;;  %v1473_v16 = vld [vmem:[%s2546_s4 + $0x450] sm:$0xff] }
  0xe8   : > { %510 = vmatpush.msra.mxu1 %v393_v17  ;;  %794 = vmatpush.msrb.mxu0 %v1450_v10 }
  0xea   : > { %511 = vmatpush.msra.mxu1 %v391_v18  ;;  %795 = vmatpush.msrb.mxu0 %v1448_v11 }
  0xec   : > { %512 = vmatpush.msra.mxu1 %v389_v19 }
  0xee   : > { %513 = vmatpush.msra.mxu1 %v387_v20  ;;  %v1440_v20 = vld [vmem:[%s2546_s4 + $0x368] sm:$0xff] }
  0xf0   : > { %514 = vmatpush.msra.mxu1 %v385_v21  ;;  %v1471_v21 = vld [vmem:[%s2546_s4 + $0x440] sm:$0xff] }
  0xf2   : > { %515 = vmatpush.msra.mxu1 %v383_v22  ;;  %v1438_v22 = vld [vmem:[%s2546_s4 + $0x358] sm:$0xff] }
  0xf4   : > { %672 = vmatpush.msrb.mxu1 %v1441_v23  ;;  %v1469_v23 = vld [vmem:[%s2546_s4 + $0x430] sm:$0xff] }
  0xf6   : > { %673 = vmatpush.msrb.mxu1 %v1439_v24 }
  0xf8   : > { %674 = vmatpush.msrb.mxu1 %v1437_v28 }
  0xfa   : > { %675 = vmatpush.msrb.mxu1 %v1435_v32  ;;  %v1463_v32 = vld [vmem:[%s2546_s4 + $0x400] sm:$0xff] }
  0xfc   : > { %676 = vmatpush.msrb.mxu1 %v1433_v36 }
  0xfe   : > { %677 = vmatpush.msrb.mxu1 %v1431_v40  ;;  %v1457_v40 = vld [vmem:[%s2546_s4 + $0x3d0] sm:$0xff] }
 0x100   : > { %678 = vmatpush.msrb.mxu1 %v1429_v44  ;;  %v1453_v44 = vld [vmem:[%s2546_s4 + $0x3b0] sm:$0xff] }
 0x102   : > { %679 = vmatpush.msrb.mxu1 %v1427_v48  ;;  %v1418_v48 = vld [vmem:[%s2546_s4 + $0x2b8] sm:$0xff] }
 0x104   : > { %680 = vmatpush.msrb.mxu1 %v1425_v52 }
 0x106   : > { %681 = vmatpush.msrb.mxu1 %v1423_v56 }
 0x108   : > { %682 = vmatpush.msrb.mxu1 %v1421_v60 }
 0x10a   : > { %683 = vmatpush.msrb.mxu1 %v1419_v0 }
 0x10c   : > { %684 = vmatpush.msrb.mxu1 %v1417_v4 }
 0x10e   : > { %685 = vmatpush.msrb.mxu1 %v1415_v6 }
 0x154   : > { %v371_v12 = vpop.f32.mrf.mxu1 }
 0x155   : > { %378 = vst.msk [vmem:[#allocation3] sm:$0xff] %vm377_vm3, %v371_v12  ;;  %v807_v12 = vld [vmem:[%s2547_s5] sm:$0x3] }
 0x15c   : > { %v374_v13 = vpop.f32.mrf.mxu1  ;;  %v381_v14 = vld [vmem:[#allocation3] sm:$0xff] }
 0x15d   : > { %380 = vst.msk [vmem:[#allocation3 + $0x8] sm:$0x3f] %vm379_vm4, %v374_v13  ;;  %1379 = vmatmul.msk.f32.vlgmr.msra.gmra.mxu1 %vm377_vm3, %v381_v14 }
 0x164   : > { %v411_v17 = vld [vmem:[#allocation3 + $0x1] sm:$0xff]  ;;  %v412_v24 = vld [vmem:[#allocation3 + $0x9] sm:$0x3]  ;;  %v634_v35 = vld [vmem:[#allocation3 + $0xb] sm:$0x3] }
 0x165   : > { %v382_v18 = vld [vmem:[#allocation3 + $0x8] sm:$0x3]  ;;  %1375 = vmatmul.msk.f32.vlgmr.msrb.gmra.mxu2 %vm377_vm3, %v411_v17  ;;  %1377 = vmatmul.msk.f32.vlgmr.msrb.gmra.mxu3 %vm377_vm3, %v411_v17  ;;  %v547_v27 = vld [vmem:[#allocation3 + $0xa] sm:$0x3]  ;;  %v721_v45 = vld [vmem:[#allocation3 + $0xc] sm:$0x3] }
 0x166   : > { %v546_v19 = vld [vmem:[#allocation3 + $0x2] sm:$0xff]  ;;  %1380 = vmatmul.msk.f32.gmra.mxu1 %vm377_vm3, %v382_v18  ;;  %695 = vmatpush.msrb.mxu2 %v1442_v15  ;;  %v809_v17 = vperm.slane %v807_v12, 0 }
 0x167   : > { %1413 = vmatmul.msk.f32.vlgmr.msra.gmra.mxu0 %vm377_vm3, %v546_v19  ;;  %759 = vmatpush.msrb.mxu3 %v1473_v16  ;;  %v633_v28 = vld [vmem:[#allocation3 + $0x3] sm:$0xff] }
 0x168   : > { %696 = vmatpush.msrb.mxu2 %v1440_v20  ;;  %v720_v36 = vld [vmem:[#allocation3 + $0x4] sm:$0xff] }
 0x169   : > { %760 = vmatpush.msrb.mxu3 %v1471_v21 }
 0x16a   : > { %697 = vmatpush.msrb.mxu2 %v1438_v22  ;;  %v810_v22 = vperm.slane %v807_v12, 1  ;;  %v1527_v12 = vld [vmem:[%s2549_s7 + $0x1a0] sm:$0xff] (%p39_p0) }
 0x16b   : > { %761 = vmatpush.msrb.mxu3 %v1469_v23 }
 0x16c   : > { %698 = vmatpush.msrb.mxu2 %v1436_v25 }
 0x16d   : > { %1376 = vmatmul.msk.f32.gmra.mxu2 %vm377_vm3, %v412_v24  ;;  %1378 = vmatmul.msk.f32.gmra.mxu3 %vm377_vm3, %v412_v24 }
 0x16e   : > { %1443 = vmatmul.msk.f32.vlgmr.msrb.gmra.mxu1 %vm377_vm3, %v633_v28  ;;  %762 = vmatpush.msrb.mxu3 %v1467_v26 }
 0x16f   : > { %1414 = vmatmul.msk.f32.gmra.mxu0 %vm377_vm3, %v547_v27  ;;  %699 = vmatpush.msrb.mxu2 %v1434_v29 }
 0x170   : > { %763 = vmatpush.msrb.mxu3 %v1465_v30 }
 0x171   : > { %700 = vmatpush.msrb.mxu2 %v1432_v31 }
 0x172   : > { %764 = vmatpush.msrb.mxu3 %v1463_v32 }
 0x173   : > { %701 = vmatpush.msrb.mxu2 %v1430_v33 }
 0x174   : > { %765 = vmatpush.msrb.mxu3 %v1461_v34 }
 0x175   : > { %1381 = vmatmul.msk.f32.vlgmr.msra.gmra.mxu2 %vm377_vm3, %v381_v14  ;;  %1411 = vmatmul.msk.f32.vlgmr.msra.gmra.mxu3 %vm377_vm3, %v546_v19 }
 0x176   : > { %1444 = vmatmul.msk.f32.gmra.mxu1 %vm377_vm3, %v634_v35  ;;  %702 = vmatpush.msrb.mxu2 %v1428_v37  ;;  %v879_v37 = vlaneseq }
 0x177   : > { %1477 = vmatmul.msk.f32.vlgmr.msrb.gmra.mxu0 %vm377_vm3, %v720_v36  ;;  %766 = vmatpush.msrb.mxu3 %v1459_v38 }
 0x178   : > { %703 = vmatpush.msrb.mxu2 %v1426_v39  ;;  %vm2214_vm8 = vcmp.lt.s32.totalorder %v879_v37, 160  ;;  %v1545_v37 = vld [vmem:[%s2549_s7 + $0x228] sm:$0xff] (%p39_p0) }
 0x179   : > { %767 = vmatpush.msrb.mxu3 %v1457_v40  ;;  %v1520_v40 = vld [vmem:[%s2549_s7 + $0x168] sm:$0xff] (%p39_p0) }
 0x17a   : > { %704 = vmatpush.msrb.mxu2 %v1424_v41 }
 0x17b   : > { %768 = vmatpush.msrb.mxu3 %v1455_v42 }
 0x17c   : > { %705 = vmatpush.msrb.mxu2 %v1422_v43 }
 0x17d   : > { %1382 = vmatmul.msk.f32.gmra.mxu2 %vm377_vm3, %v382_v18  ;;  %1412 = vmatmul.msk.f32.gmra.mxu3 %vm377_vm3, %v547_v27 }
 0x17e   : > { %769 = vmatpush.msrb.mxu3 %v1453_v44  ;;  %706 = vmatpush.msrb.mxu2 %v1420_v46  ;;  %v946_v46 = vld [vmem:[%s2549_s7 + $0x78] sm:$0xff] (%p39_p0) }
 0x17f   : > { %1478 = vmatmul.msk.f32.gmra.mxu0 %vm377_vm3, %v721_v45 }
 0x180   : > { %770 = vmatpush.msrb.mxu3 %v1451_v47  ;;  %707 = vmatpush.msrb.mxu2 %v1418_v48  ;;  %v950_v47 = vld [vmem:[%s2549_s7 + $0x98] sm:$0xff] (%p39_p0) }
 0x181   :  { %v1512_v48 = vld [vmem:[%s2549_s7 + $0x138] sm:$0xff] (%p39_p0) }
 0x182   : > { %771 = vmatpush.msrb.mxu3 %v1449_v49  ;;  %708 = vmatpush.msrb.mxu2 %v1416_v50  ;;  %v945_v49 = vld [vmem:[%s2549_s7 + $0x70] sm:$0xff] (%p39_p0) }
 0x183   :  { %v949_v50 = vld [vmem:[%s2549_s7 + $0x90] sm:$0xff] (%p39_p0) }
 0x184   : > { %772 = vmatpush.msrb.mxu3 %v1447_v51  ;;  %v1511_v51 = vld [vmem:[%s2549_s7 + $0x130] sm:$0xff] (%p39_p0) }
 0x185   : > { %1445 = vmatmul.msk.f32.vlgmr.msrb.gmra.mxu2 %vm377_vm3, %v633_v28  ;;  %1475 = vmatmul.msk.f32.vlgmr.msrb.gmra.mxu3 %vm377_vm3, %v720_v36 }
 0x186   :  { %1054 = vmatpush.msra.mxu3 (%p39_p0), %v950_v47 }
 0x188   :  { %1055 = vmatpush.msra.mxu3 (%p39_p0), %v949_v50  ;;  %v1518_v50 = vld [vmem:[%s2549_s7 + $0x158] sm:$0xff] (%p39_p0) }
 0x18d   : > { %1446 = vmatmul.msk.f32.gmra.mxu2 %vm377_vm3, %v634_v35  ;;  %1476 = vmatmul.msk.f32.gmra.mxu3 %vm377_vm3, %v721_v45  ;;  %v821_v35 = vld [vmem:[%s2548_s6] sm:$0x1f] }
 0x1da   : > { %v517_v56 = vpop.f32.mrf.mxu1 }
 0x1e3   : > { %v520_v60 = vpop.f32.mrf.mxu1 }
 0x1e4   : > { %v623_v57 = vpop.f32.mrf.mxu0 }
 0x1e8   : > { %v465_v52 = vpop.f32.mrf.mxu2  ;;  %v488_v53 = vpop.f32.mrf.mxu3 }
 0x1e9   : > { %v518_v2 = vadd.f32 %v517_v56, %v465_v52  ;;  %v1508_v52 = vld [vmem:[%s2549_s7 + $0x118] sm:$0xff] (%p39_p0)  ;;  %v1507_v56 = vld [vmem:[%s2549_s7 + $0x110] sm:$0xff] (%p39_p0) }
 0x1ea   :  { %979 = vmatpush.msra.mxu0 (%p39_p0), %v1508_v52  ;;  %v1493_v52 = vld [vmem:[%s2549_s7 + $0xa0] sm:$0xff] (%p39_p0) }
 0x1eb   : > { %v687_v0 = vpop.f32.mrf.mxu1 }
 0x1ec   : > { %v626_v61 = vpop.f32.mrf.mxu0  ;;  %980 = vmatpush.msra.mxu0 (%p39_p0), %v1507_v56  ;;  %v1541_v56 = vld [vmem:[%s2549_s7 + $0x208] sm:$0xff] (%p39_p0) }
 0x1f0   : > { %v468_v54 = vpop.f32.mrf.mxu2  ;;  %v491_v55 = vpop.f32.mrf.mxu3 }
 0x1f1   : > { %v521_v6 = vadd.f32 %v520_v60, %v468_v54  ;;  %v948_v54 = vld [vmem:[%s2549_s7 + $0x88] sm:$0xff] (%p39_p0)  ;;  %v1534_v60 = vld [vmem:[%s2549_s7 + $0x1d8] sm:$0xff] (%p39_p0) }
 0x1f2   :  { %1056 = vmatpush.msra.mxu3 (%p39_p0), %v948_v54  ;;  %v1571_v54 = vld [vmem:[%s2549_s7 + $0x2f0] sm:$0xff] (%p39_p0) }
 0x1f3   : > { %v690_v14 = vpop.f32.mrf.mxu1 }
 0x1f4   : > { %v797_v3 = vpop.f32.mrf.mxu0 }
 0x1f8   : > { %v540_v58 = vpop.f32.mrf.mxu2  ;;  %v600_v59 = vpop.f32.mrf.mxu3 }
 0x1f9   : > { %v541_v1 = vadd.f32 %v540_v58, %v488_v53  ;;  %v629_v7 = vadd.f32 %v600_v59, %v518_v2  ;;  %v944_v53 = vld [vmem:[%s2549_s7 + $0x68] sm:$0xff] (%p39_p0)  ;;  %v947_v58 = vld [vmem:[%s2549_s7 + $0x80] sm:$0xff] (%p39_p0)  ;;  %v941_v2 = vld [vmem:[%s2549_s7 + $0x50] sm:$0xff] (%p39_p0) }
 0x1fa   :  { %v1509_v59 = vld [vmem:[%s2549_s7 + $0x120] sm:$0xff] (%p39_p0)  ;;  %1057 = vmatpush.msra.mxu3 (%p39_p0), %v947_v58  ;;  %v1570_v58 = vld [vmem:[%s2549_s7 + $0x2e8] sm:$0xff] (%p39_p0) }
 0x1fb   : > { %v630_v9 = vadd.f32 %v623_v57, %v541_v1  ;;  %v716_v13 = vadd.f32 %v687_v0, %v629_v7  ;;  %v943_v57 = vld [vmem:[%s2549_s7 + $0x60] sm:$0xff] (%p39_p0)  ;;  %v1533_v0 = vld [vmem:[%s2549_s7 + $0x1d0] sm:$0xff] (%p39_p0)  ;;  %v1528_v7 = vld [vmem:[%s2549_s7 + $0x1a8] sm:$0xff] (%p39_p0) }
 0x1fc   : > { %v800_v24 = vpop.f32.mrf.mxu0  ;;  %1121 = vmatpush.msrb.mxu3 (%p39_p0), %v1534_v60  ;;  %v1505_v1 = vld [vmem:[%s2549_s7 + $0x100] sm:$0xff] (%p39_p0) }
 0x1fd   :  { %v1540_v60 = vld [vmem:[%s2549_s7 + $0x200] sm:$0xff] (%p39_p0) }
 0x1fe   :  { %1122 = vmatpush.msrb.mxu3 (%p39_p0), %v1533_v0  ;;  %v1539_v0 = vld [vmem:[%s2549_s7 + $0x1f8] sm:$0xff] (%p39_p0) }
 0x200   : > { %v543_v62 = vpop.f32.mrf.mxu2  ;;  %v603_v63 = vpop.f32.mrf.mxu3 }
 0x201   : > { %v544_v8 = vadd.f32 %v543_v62, %v491_v55  ;;  %v631_v10 = vadd.f32 %v603_v63, %v521_v6  ;;  %v1510_v55 = vld [vmem:[%s2549_s7 + $0x128] sm:$0xff] (%p39_p0)  ;;  %v942_v62 = vld [vmem:[%s2549_s7 + $0x58] sm:$0xff] (%p39_p0) }
 0x202   :  { %v1530_v63 = vld [vmem:[%s2549_s7 + $0x1b8] sm:$0xff] (%p39_p0)  ;;  %v940_v6 = vld [vmem:[%s2549_s7 + $0x48] sm:$0xff] (%p39_p0) }
 0x203   : > { %v632_v15 = vadd.f32 %v626_v61, %v544_v8  ;;  %v718_v19 = vadd.f32 %v690_v14, %v631_v10  ;;  %v1506_v61 = vld [vmem:[%s2549_s7 + $0x108] sm:$0xff] (%p39_p0)  ;;  %v1531_v8 = vld [vmem:[%s2549_s7 + $0x1c0] sm:$0xff] (%p39_p0) }
 0x204   :  { %981 = vmatpush.msra.mxu0 (%p39_p0), %v1506_v61  ;;  %v939_v10 = vld [vmem:[%s2549_s7 + $0x40] sm:$0xff] (%p39_p0)  ;;  %v1502_v14 = vld [vmem:[%s2549_s7 + $0xe8] sm:$0xff] (%p39_p0) }
 0x205   :  { %v1569_v61 = vld [vmem:[%s2549_s7 + $0x2e0] sm:$0xff] (%p39_p0) }
 0x206   :  { %982 = vmatpush.msra.mxu0 (%p39_p0), %v1505_v1 }
 0x208   : > { %v710_v4 = vpop.f32.mrf.mxu2  ;;  %v774_v5 = vpop.f32.mrf.mxu3 }
 0x209   : > { %v717_v11 = vadd.f32 %v710_v4, %v630_v9  ;;  %v803_v16 = vadd.f32 %v774_v5, %v716_v13  ;;  %v1532_v4 = vld [vmem:[%s2549_s7 + $0x1c8] sm:$0xff] (%p39_p0)  ;;  %v1504_v5 = vld [vmem:[%s2549_s7 + $0xf8] sm:$0xff] (%p39_p0)  ;;  %v1503_v9 = vld [vmem:[%s2549_s7 + $0xf0] sm:$0xff] (%p39_p0) }
 0x20a   :  { %1123 = vmatpush.msrb.mxu3 (%p39_p0), %v1532_v4  ;;  %983 = vmatpush.msra.mxu0 (%p39_p0), %v1504_v5  ;;  %v1551_v13 = vld [vmem:[%s2549_s7 + $0x258] sm:$0xff] (%p39_p0)  ;;  %v1554_v4 = vld [vmem:[%s2549_s7 + $0x270] sm:$0xff] (%p39_p0) }
 0x20b   : > { %v804_v20 = vadd.f32 %v797_v3, %v717_v11  ;;  %v813_v27 = vadd.f32 %v809_v17, %v803_v16  ;;  %v1529_v3 = vld [vmem:[%s2549_s7 + $0x1b0] sm:$0xff] (%p39_p0)  ;;  %v1526_v16 = vld [vmem:[%s2549_s7 + $0x198] sm:$0xff] (%p39_p0) }
 0x20c   :  { %1124 = vmatpush.msrb.mxu3 (%p39_p0), %v1531_v8  ;;  %984 = vmatpush.msra.mxu0 (%p39_p0), %v1503_v9  ;;  %v1567_v5 = vld [vmem:[%s2549_s7 + $0x2d0] sm:$0xff] (%p39_p0)  ;;  %v1566_v8 = vld [vmem:[%s2549_s7 + $0x2c8] sm:$0xff] (%p39_p0)  ;;  %v1536_v9 = vld [vmem:[%s2549_s7 + $0x1e0] sm:$0xff] (%p39_p0) }
 0x20d   : > { %v814_v30 = vadd.f32 %v810_v22, %v804_v20  ;;  %v817_v33 = vmax.f32 %v813_v27, 0.0  ;;  %v1525_v20 = vld [vmem:[%s2549_s7 + $0x190] sm:$0xff] (%p39_p0)  ;;  %v935_v27 = vld [vmem:[%s2549_s7 + $0x20] sm:$0xff] (%p39_p0) }
 0x20e   :  { %985 = vmatpush.msra.mxu0 (%p39_p0), %v1502_v14  ;;  %v1564_v14 = vld [vmem:[%s2549_s7 + $0x2b8] sm:$0xff] (%p39_p0) }
 0x20f   : > { %v818_v34 = vmax.f32 %v814_v30, 0.0  ;;  %v1498_v30 = vld [vmem:[%s2549_s7 + $0xc8] sm:$0xff] (%p39_p0) }
 0x210   : > { %v713_v18 = vpop.f32.mrf.mxu2  ;;  %v777_v23 = vpop.f32.mrf.mxu3 }
 0x211   : > { %v719_v21 = vadd.f32 %v713_v18, %v632_v15  ;;  %v805_v25 = vadd.f32 %v777_v23, %v718_v19  ;;  %v938_v15 = vld [vmem:[%s2549_s7 + $0x38] sm:$0xff] (%p39_p0)  ;;  %v1501_v18 = vld [vmem:[%s2549_s7 + $0xe0] sm:$0xff] (%p39_p0)  ;;  %v937_v19 = vld [vmem:[%s2549_s7 + $0x30] sm:$0xff] (%p39_p0) }
 0x212   :  { %986 = vmatpush.msra.mxu0 (%p39_p0), %v1501_v18  ;;  %v936_v23 = vld [vmem:[%s2549_s7 + $0x28] sm:$0xff] (%p39_p0) }
 0x213   : > { %v806_v26 = vadd.f32 %v800_v24, %v719_v21  ;;  %v815_v28 = vadd.f32 %v809_v17, %v805_v25  ;;  %v1550_v17 = vld [vmem:[%s2549_s7 + $0x250] sm:$0xff] (%p39_p0)  ;;  %v1549_v21 = vld [vmem:[%s2549_s7 + $0x248] sm:$0xff] (%p39_p0)  ;;  %v1548_v25 = vld [vmem:[%s2549_s7 + $0x240] sm:$0xff] (%p39_p0) }
 0x214   :  { %v1524_v24 = vld [vmem:[%s2549_s7 + $0x188] sm:$0xff] (%p39_p0) }
 0x215   : > { %v816_v29 = vadd.f32 %v810_v22, %v806_v26  ;;  %v819_v31 = vmax.f32 %v815_v28, 0.0  ;;  %v1500_v22 = vld [vmem:[%s2549_s7 + $0xd8] sm:$0xff] (%p39_p0)  ;;  %v1499_v26 = vld [vmem:[%s2549_s7 + $0xd0] sm:$0xff] (%p39_p0)  ;;  %v1523_v28 = vld [vmem:[%s2549_s7 + $0x180] sm:$0xff] (%p39_p0) }
 0x216   :  { %987 = vmatpush.msra.mxu0 (%p39_p0), %v1500_v22  ;;  %v1562_v18 = vld [vmem:[%s2549_s7 + $0x2a8] sm:$0xff] (%p39_p0) }
 0x217   : > { %v820_v32 = vmax.f32 %v816_v29, 0.0  ;;  %1479 = vmatpush.msk.msra.mxu1 %vm826_vm5, %v819_v31  ;;  %v1547_v29 = vld [vmem:[%s2549_s7 + $0x238] sm:$0xff] (%p39_p0) }
 0x218   :  { %988 = vmatpush.msra.mxu0 (%p39_p0), %v1499_v26  ;;  %v934_v31 = vld [vmem:[%s2549_s7 + $0x18] sm:$0xff] (%p39_p0)  ;;  %v1557_v26 = vld [vmem:[%s2549_s7 + $0x280] sm:$0xff] (%p39_p0) }
 0x219   : > { %1481 = vmatpush.msk.msra.mxu2 %vm826_vm5, %v820_v32  ;;  %848 = vmatpush.msra.mxu1 %v817_v33  ;;  %v1522_v32 = vld [vmem:[%s2549_s7 + $0x178] sm:$0xff] (%p39_p0)  ;;  %v1546_v33 = vld [vmem:[%s2549_s7 + $0x230] sm:$0xff] (%p39_p0) }
 0x21a   : > { %1480 = vmatmul.msk.f32.vlgmr.msra.gmra.mxu1 %vm822_vm6, %v821_v35  ;;  %989 = vmatpush.msra.mxu0 (%p39_p0), %v1498_v30 }
 0x21b   : > { %868 = vmatpush.msra.mxu2 %v818_v34  ;;  %1011 = vmatpush.msra.mxu1 (%p39_p0), %v1512_v48  ;;  %v1497_v34 = vld [vmem:[%s2549_s7 + $0xc0] sm:$0xff] (%p39_p0)  ;;  %v1494_v48 = vld [vmem:[%s2549_s7 + $0xa8] sm:$0xff] (%p39_p0) }
 0x21c   : > { %1482 = vmatmul.msk.f32.vlgmr.msra.gmra.mxu2 %vm822_vm6, %v821_v35  ;;  %v933_v35 = vld [vmem:[%s2549_s7 + $0x10] sm:$0xff] (%p39_p0)  ;;  %990 = vmatpush.msra.mxu0 (%p39_p0), %v1497_v34 }
 0x21d   :  { %1022 = vmatpush.msra.mxu2 (%p39_p0), %v946_v46  ;;  %1012 = vmatpush.msra.mxu1 (%p39_p0), %v1511_v51  ;;  %v1542_v51 = vld [vmem:[%s2549_s7 + $0x210] sm:$0xff] (%p39_p0) }
 0x21f   :  { %1023 = vmatpush.msra.mxu2 (%p39_p0), %v945_v49  ;;  %1013 = vmatpush.msra.mxu1 (%p39_p0), %v1510_v55  ;;  %v1572_v49 = vld [vmem:[%s2549_s7 + $0x2f8] sm:$0xff] (%p39_p0)  ;;  %v1517_v55 = vld [vmem:[%s2549_s7 + $0x150] sm:$0xff] (%p39_p0) }
 0x221   :  { %1024 = vmatpush.msra.mxu2 (%p39_p0), %v944_v53  ;;  %1014 = vmatpush.msra.mxu1 (%p39_p0), %v1509_v59  ;;  %v1516_v59 = vld [vmem:[%s2549_s7 + $0x148] sm:$0xff] (%p39_p0) }
 0x223   :  { %1025 = vmatpush.msra.mxu2 (%p39_p0), %v943_v57  ;;  %1089 = vmatpush.msrb.mxu1 (%p39_p0), %v1530_v63  ;;  %v1515_v63 = vld [vmem:[%s2549_s7 + $0x140] sm:$0xff] (%p39_p0) }
 0x225   :  { %1026 = vmatpush.msra.mxu2 (%p39_p0), %v942_v62  ;;  %1090 = vmatpush.msrb.mxu1 (%p39_p0), %v1529_v3  ;;  %v1555_v62 = vld [vmem:[%s2549_s7 + $0x278] sm:$0xff] (%p39_p0)  ;;  %v1538_v3 = vld [vmem:[%s2549_s7 + $0x1f0] sm:$0xff] (%p39_p0) }
 0x227   :  { %1027 = vmatpush.msra.mxu2 (%p39_p0), %v941_v2  ;;  %1091 = vmatpush.msrb.mxu1 (%p39_p0), %v1528_v7  ;;  %v1568_v2 = vld [vmem:[%s2549_s7 + $0x2d8] sm:$0xff] (%p39_p0)  ;;  %v1553_v7 = vld [vmem:[%s2549_s7 + $0x268] sm:$0xff] (%p39_p0) }
 0x229   :  { %1028 = vmatpush.msra.mxu2 (%p39_p0), %v940_v6  ;;  %1092 = vmatpush.msrb.mxu1 (%p39_p0), %v1527_v12  ;;  %v1537_v6 = vld [vmem:[%s2549_s7 + $0x1e8] sm:$0xff] (%p39_p0)  ;;  %v1565_v12 = vld [vmem:[%s2549_s7 + $0x2c0] sm:$0xff] (%p39_p0) }
 0x22b   :  { %1029 = vmatpush.msra.mxu2 (%p39_p0), %v939_v10  ;;  %1093 = vmatpush.msrb.mxu1 (%p39_p0), %v1526_v16  ;;  %v1552_v10 = vld [vmem:[%s2549_s7 + $0x260] sm:$0xff] (%p39_p0)  ;;  %v1563_v16 = vld [vmem:[%s2549_s7 + $0x2b0] sm:$0xff] (%p39_p0) }
 0x22d   :  { %1030 = vmatpush.msra.mxu2 (%p39_p0), %v938_v15  ;;  %1094 = vmatpush.msrb.mxu1 (%p39_p0), %v1525_v20  ;;  %v1576_v15 = vld [vmem:[%s2549_s7 + $0x318] sm:$0xff] (%p39_p0)  ;;  %v1561_v20 = vld [vmem:[%s2549_s7 + $0x2a0] sm:$0xff] (%p39_p0) }
 0x22f   :  { %1031 = vmatpush.msra.mxu2 (%p39_p0), %v937_v19  ;;  %1095 = vmatpush.msrb.mxu1 (%p39_p0), %v1524_v24  ;;  %v1574_v19 = vld [vmem:[%s2549_s7 + $0x308] sm:$0xff] (%p39_p0)  ;;  %v1559_v24 = vld [vmem:[%s2549_s7 + $0x290] sm:$0xff] (%p39_p0) }
 0x231   :  { %1032 = vmatpush.msra.mxu2 (%p39_p0), %v936_v23  ;;  %1096 = vmatpush.msrb.mxu1 (%p39_p0), %v1523_v28  ;;  %v1560_v23 = vld [vmem:[%s2549_s7 + $0x298] sm:$0xff] (%p39_p0) }
 0x233   :  { %1033 = vmatpush.msra.mxu2 (%p39_p0), %v935_v27  ;;  %1097 = vmatpush.msrb.mxu1 (%p39_p0), %v1522_v32 }
 0x235   :  { %1034 = vmatpush.msra.mxu2 (%p39_p0), %v934_v31 }
 0x237   :  { %1035 = vmatpush.msra.mxu2 (%p39_p0), %v933_v35 }
 0x297   : > { %v850_v36 = vpop.f32.mrf.mxu1 }
 0x298   : > { %893 = vst [vmem:[#allocation1] sm:$0xff] %v850_v36 }
 0x29f   : > { %v870_v38 = vpop.f32.mrf.mxu2 }
 0x2a0   : > { %v875_v39 = vrot.slane %v870_v38, 7  ;;  %894 = vst [vmem:[#allocation1 + $0x9] sm:$0xff] %v870_v38 }
 0x2a2   : > { %v877_v41 = vsel %vm876_vm7, %v850_v36, %v875_v39  ;;  %v932_v39 = vld [vmem:[%s2549_s7 + $0x8] sm:$0xff] (%p39_p0) }
 0x2a3   : > { %891 = vst.msk [vmem:[%s890_s28] ss:$8 sm:$0x3] %vm2214_vm8, %v877_v41  ;;  %v1544_v41 = vld [vmem:[%s2549_s7 + $0x220] sm:$0xff] (%p39_p0)  ;;  %1036 = vmatpush.msra.mxu2 (%p39_p0), %v932_v39 }
 0x2a7   : > { %v896_v42 = vld [vmem:[#allocation1 + $0x1] ss:$9 sm:$0xff] }
 0x2a8   : > { %1486 = vst.msk [vmem:[%s890_s28 + $0x10] ss:$8 sm:$0x3] %vm2214_vm8, %v896_v42  ;;  %v1495_v42 = vld [vmem:[%s2549_s7 + $0xb0] sm:$0xff] (%p39_p0) }
 0x2a9   : > { %902 = vst [vmem:[#allocation1] sm:$0xff] %v850_v36 }
 0x2aa   : > { %903 = vst [vmem:[#allocation1 + $0x9] sm:$0xff] %v870_v38 }
 0x2b1   : > { %v905_v43 = vld [vmem:[#allocation1 + $0x2] ss:$9 sm:$0xff] }
 0x2b2   : > { %1488 = vst.msk [vmem:[%s890_s28 + $0x20] ss:$8 sm:$0x3] %vm2214_vm8, %v905_v43  ;;  %v931_v43 = vld [vmem:[%s2549_s7] sm:$0xff] (%p39_p0) }
 0x2b3   : > { %911 = vst [vmem:[#allocation1] sm:$0xff] %v850_v36  ;;  %1037 = vmatpush.msra.mxu2 (%p39_p0), %v931_v43 }
 0x2b4   : > { %912 = vst [vmem:[#allocation1 + $0x9] sm:$0xff] %v870_v38 }
 0x2b5   :  { %1225 = vmatpush.msrb.mxu2 (%p39_p0), %v1572_v49 }
 0x2b7   :  { %1226 = vmatpush.msrb.mxu2 (%p39_p0), %v1571_v54 }
 0x2b9   :  { %1227 = vmatpush.msrb.mxu2 (%p39_p0), %v1570_v58 }
 0x2bb   : > { %v914_v44 = vld [vmem:[#allocation1 + $0x3] ss:$9 sm:$0xff]  ;;  %1228 = vmatpush.msrb.mxu2 (%p39_p0), %v1569_v61 }
 0x2bc   : > { %1490 = vst.msk [vmem:[%s890_s28 + $0x30] ss:$8 sm:$0x3] %vm2214_vm8, %v914_v44  ;;  %v1519_v44 = vld [vmem:[%s2549_s7 + $0x160] sm:$0xff] (%p39_p0) }
 0x2bd   : > { %920 = vst [vmem:[#allocation1] sm:$0xff] %v850_v36  ;;  %v1521_v36 = vld [vmem:[%s2549_s7 + $0x170] sm:$0xff] (%p39_p0)  ;;  %1229 = vmatpush.msrb.mxu2 (%p39_p0), %v1568_v2 }
 0x2be   : > { %921 = vst [vmem:[#allocation1 + $0x9] sm:$0xff] %v870_v38  ;;  %v1496_v38 = vld [vmem:[%s2549_s7 + $0xb8] sm:$0xff] (%p39_p0)  ;;  %1098 = vmatpush.msrb.mxu1 (%p39_p0), %v1521_v36 }
 0x2bf   :  { %991 = vmatpush.msra.mxu0 (%p39_p0), %v1496_v38  ;;  %1230 = vmatpush.msrb.mxu2 (%p39_p0), %v1567_v5 }
 0x2c0   :  { %1099 = vmatpush.msrb.mxu1 (%p39_p0), %v1520_v40 }
 0x2c1   :  { %992 = vmatpush.msra.mxu0 (%p39_p0), %v1495_v42  ;;  %1231 = vmatpush.msrb.mxu2 (%p39_p0), %v1566_v8 }
 0x2c2   :  { %41 = sbr.rel (!%p39_p0) target bundleno = 5 (0x5), region = 89  ;;  %1100 = vmatpush.msrb.mxu1 (%p39_p0), %v1519_v44 }
 0x2c3   :  { %993 = vmatpush.msra.mxu0 (%p39_p0), %v1494_v48  ;;  %1232 = vmatpush.msrb.mxu2 (%p39_p0), %v1565_v12 }
 0x2c4   :  { %1101 = vmatpush.msrb.mxu1 (%p39_p0), %v1518_v50 }
 0x2c5   : > { %v923_v45 = vld [vmem:[#allocation1 + $0x4] ss:$9 sm:$0xff]  ;;  %994 = vmatpush.msra.mxu0 (%p39_p0), %v1493_v52  ;;  %1233 = vmatpush.msrb.mxu2 (%p39_p0), %v1564_v14 }
 0x2c6   : > { %1492 = vst.msk [vmem:[%s890_s28 + $0x40] ss:$8 sm:$0x3] %vm2214_vm8, %v923_v45  ;;  %v1543_v45 = vld [vmem:[%s2549_s7 + $0x218] sm:$0xff] (%p39_p0)  ;;  %1102 = vmatpush.msrb.mxu1 (%p39_p0), %v1517_v55 }
 0x2c7   :  { %1189 = vmatpush.msrb.mxu0 %v1555_v62  ;;  %1234 = vmatpush.msrb.mxu2 %v1563_v16 }
 0x2c8   :  { %1103 = vmatpush.msrb.mxu1 %v1516_v59 }
 0x2c9   :  { %1190 = vmatpush.msrb.mxu0 %v1554_v4  ;;  %1235 = vmatpush.msrb.mxu2 %v1562_v18 }
 0x2ca   :  { %1104 = vmatpush.msrb.mxu1 %v1515_v63 }
 0x2cb   :  { %1191 = vmatpush.msrb.mxu0 %v1553_v7  ;;  %1236 = vmatpush.msrb.mxu2 %v1561_v20 }
 0x2cd   :  { %v930_v11 = vld [vmem:[#allocation4 + $0x8] sm:$0xff]  ;;  %v953_v46 = vld [vmem:[#allocation4 + $0x18] sm:$0xff]  ;;  %v929_v47 = vld [vmem:[#allocation4] sm:$0xff]  ;;  %1192 = vmatpush.msrb.mxu0 %v1552_v10  ;;  %1237 = vmatpush.msrb.mxu2 %v1560_v23 }
 0x2ce   :  { %1514 = vmatmul.msk.f32.vlgmr.msra.gmra.mxu3 %vm975_vm9, %v930_v11  ;;  %1513 = vmatmul.msk.f32.vlgmr.msra.gmra.mxu1 %vm975_vm9, %v953_v46  ;;  %v1064_v53 = vld [vmem:[#allocation4 + $0x28] sm:$0xff]  ;;  %v952_v57 = vld [vmem:[#allocation4 + $0x10] sm:$0xff]  ;;  %v1063_v1 = vld [vmem:[#allocation4 + $0x20] sm:$0xff] }
 0x2cf   :  { %1157 = vmatpush.msra.mxu3 %v1551_v13  ;;  %1038 = vmatmul.f32.vlgmr.msra.gmra.mxu2 %v929_v47  ;;  %v1131_v11 = vld [vmem:[#allocation4 + $0x30] sm:$0xff]  ;;  %v1132_v13 = vld [vmem:[#allocation4 + $0x38] sm:$0xff]  ;;  %v1200_v22 = vld [vmem:[#allocation4 + $0x48] sm:$0xff] }
 0x2d0   :  { %995 = vmatmul.f32.vlgmr.msra.gmra.mxu0 %v952_v57  ;;  %1238 = vmatpush.msrb.mxu2 %v1559_v24  ;;  %v1199_v27 = vld [vmem:[#allocation4 + $0x40] sm:$0xff]  ;;  %v1589_v46 = vld [vmem:[%s2550_s8] ss:$0 sm:$0xff] }
 0x2d1   :  { %1158 = vmatpush.msra.mxu3 %v1550_v17  ;;  %v1575_v17 = vld [vmem:[%s2549_s7 + $0x310] sm:$0xff]  ;;  %1257 = vmatpush.msra.mxu0 %v1576_v15 }
 0x2d3   :  { %1159 = vmatpush.msra.mxu3 %v1549_v21  ;;  %1258 = vmatpush.msra.mxu0 %v1575_v17  ;;  %v1573_v21 = vld [vmem:[%s2549_s7 + $0x300] sm:$0xff] }
 0x2d5   :  { %1160 = vmatpush.msra.mxu3 %v1548_v25  ;;  %1259 = vmatpush.msra.mxu0 %v1574_v19  ;;  %v1558_v25 = vld [vmem:[%s2549_s7 + $0x288] sm:$0xff] }
 0x2d6   :  { %1535 = vmatmul.msk.f32.vlgmr.msrb.gmra.mxu3 %vm975_vm9, %v1064_v53  ;;  %1105 = vmatmul.f32.vlgmr.msrb.gmra.mxu1 %v1063_v1 }
 0x2d7   :  { %1161 = vmatpush.msra.mxu3 %v1547_v29  ;;  %1260 = vmatpush.msra.mxu0 %v1573_v21 }
 0x2d8   :  { %1556 = vmatmul.msk.f32.vlgmr.msrb.gmra.mxu0 %vm975_vm9, %v1132_v13  ;;  %1239 = vmatpush.msrb.mxu2 %v1558_v25 }
 0x2d9   :  { %1162 = vmatpush.msra.mxu3 %v1546_v33 }
 0x2da   :  { %1240 = vmatpush.msrb.mxu2 %v1557_v26 }
 0x2db   :  { %1163 = vmatpush.msra.mxu3 %v1545_v37  ;;  %1241 = vmatmul.f32.vlgmr.msrb.gmra.mxu2 %v1199_v27 }
 0x2dd   :  { %1164 = vmatpush.msra.mxu3 %v1544_v41 }
 0x2df   :  { %1165 = vmatpush.msra.mxu3 %v1543_v45 }
 0x2e0   :  { %1577 = vmatmul.msk.f32.vlgmr.msra.gmra.mxu0 %vm975_vm9, %v1200_v22 }
 0x2e1   :  { %1166 = vmatpush.msra.mxu3 %v1542_v51 }
 0x2e3   :  { %1167 = vmatpush.msra.mxu3 %v1541_v56 }
 0x2e5   :  { %1168 = vmatpush.msra.mxu3 %v1540_v60 }
 0x2e7   :  { %1169 = vmatpush.msra.mxu3 %v1539_v0 }
 0x2e9   :  { %1170 = vmatpush.msra.mxu3 %v1538_v3 }
 0x2eb   :  { %1171 = vmatpush.msra.mxu3 %v1537_v6 }
 0x2ed   :  { %1172 = vmatpush.msra.mxu3 %v1536_v9 }
 0x2ee   :  { %1173 = vmatmul.f32.vlgmr.msra.gmra.mxu3 %v1131_v11 }
 0x34b   :  { %v1016_v29 = vpop.f32.mrf.mxu1 }
 0x34d   :  { %v996_v30 = vpop.f32.mrf.mxu0 }
 0x34e   :  { %v1017_v32 = vadd.f32 %v1016_v29, %v996_v30 }
 0x351   :  { %v1059_v28 = vpop.f32.mrf.mxu3 }
 0x352   :  { %v1039_v33 = vpop.f32.mrf.mxu2 }
 0x353   :  { %v1040_v35 = vadd.f32 %v1039_v33, %v1017_v32  ;;  %v1106_v36 = vpop.f32.mrf.mxu1 }
 0x355   :  { %v1194_v34 = vpop.f32.mrf.mxu0  ;;  %v1060_v38 = vadd.f32 %v1059_v28, %v1040_v35 }
 0x359   :  { %v1126_v31 = vpop.f32.mrf.mxu3 }
 0x35a   :  { %v1127_v39 = vadd.f32 %v1126_v31, %v1106_v36 }
 0x35c   :  { %v1129_v42 = vadd.f32 %v1127_v39, %v1060_v38 }
 0x35d   :  { %v1262_v41 = vpop.f32.mrf.mxu0 }
 0x35e   :  { %v1242_v43 = vpop.f32.mrf.mxu2 }
 0x35f   :  { %v1263_v45 = vadd.f32 %v1262_v41, %v1242_v43 }
 0x371   :  { %v1174_v37 = vpop.f32.mrf.mxu3 }
 0x372   :  { %v1195_v40 = vadd.f32 %v1194_v34, %v1174_v37 }
 0x374   :  { %v1197_v44 = vadd.f32 %v1195_v40, %v1129_v42 }
 0x376   :  { %v1265_v47 = vadd.f32 %v1263_v45, %v1197_v44 }
 0x378   :  { %v1270_v48 = vadd.f32 %v1589_v46, %v1265_v47 }
 0x37a   :  { %1271 = vst [vmem:[%s2551_s9] sm:$0xff] %v1270_v48 }

</bundles_post_ra>
